<compile_context>
chip_gen: v6e
topology: v6e:2x2x1
jax: 0.10.0
libtpu: 0.0.40
codegen_flags: <defaults>
</compile_context>

<pallas_src>
import functools

import numpy as np

import jax
import jax.numpy as jnp
from jax.experimental import pallas as pl
from jax.experimental.pallas import tpu as pltpu

# ---------------- scaled-down ViT config (dino-vitb16 analogue) -------------
B = 2                     # batch
C = 3                     # image channels
IMG = 16                  # spatial size
PATCH = 8                 # patch size  -> 2x2 = 4 patches
NPATCH = (IMG // PATCH) ** 2
SEQ = NPATCH + 1          # +CLS token (= 5 real rows)
SEQ_PAD = 8               # padded to a full sublane tile
D = 32                    # hidden size       (768 in dino-vitb16)
NHEAD = 4                 # attention heads   (12 in dino-vitb16)
HDIM = D // NHEAD
MLP = 64                  # intermediate size (3072 in dino-vitb16)
NLAYER = 2                # encoder layers    (12 in dino-vitb16)
OUT1 = 39                 # linear1 output dim
OUT2 = 30                 # linear2 output dim
EPS = 1e-12               # HF ViT layernorm eps
HEAD_PAD = 128            # lane-dense packed width (39 + 30 <= 128)
CPP = C * PATCH * PATCH   # flattened patch length

MXU_DTYPE = jnp.bfloat16
ATT_SCALE = 1.0 / float(HDIM) ** 0.5
NEG_INF = -1e9


# ----------------------------- kernel helpers --------------------------------
def _layernorm(x, g, b):
    mu = jnp.mean(x, axis=-1, keepdims=True)
    var = jnp.mean((x - mu) ** 2, axis=-1, keepdims=True)
    return (x - mu) * jax.lax.rsqrt(var + EPS) * g + b


def _mm(a, b):
    """MXU matmul: bf16 operands (no-op cast for pre-cast weights), f32 acc."""
    return jnp.dot(a.astype(MXU_DTYPE), b.astype(MXU_DTYPE),
                   preferred_element_type=jnp.float32)


def _erf(x):
    # Abramowitz & Stegun 7.1.26 (|err| < 1.5e-7): exact-GELU numerics with
    # only mul/add/div/exp/select.
    a1, a2, a3, a4, a5 = 0.254829592, -0.284496736, 1.421413741, -1.453152027, 1.061405429
    z = jnp.maximum(x, -x)
    t = 1.0 / (1.0 + 0.3275911 * z)
    poly = ((((a5 * t + a4) * t + a3) * t + a2) * t + a1) * t
    y = 1.0 - poly * jnp.exp(-z * z)
    return jnp.where(x >= 0.0, y, -y)


def _gelu(x):
    # torch.nn.functional.gelu / HF ViT default = exact erf GELU.
    return 0.5 * x * (1.0 + _erf(x * 0.7071067811865476))


# ----------------------------- fused Pallas kernel ---------------------------
def _vit_fused_kernel(bsz, patches_ref, pw_ref, pos_ref, kvm_ref, abias_ref,
                      pool_ref, wqkv_ref, wo_ref, w1_ref, w2_ref,
                      lvec_ref, fvec_ref, hw_ref, out_ref):
    BS = bsz * SEQ_PAD        # batch-stacked sequence rows

    # ---- patch embedding (+ folded CLS / pos / patch bias slab) ----
    x = _mm(patches_ref[...], pw_ref[...]) + pos_ref[...]          # (BS, D) f32

    kv_mask = kvm_ref[...]            # (NHEAD*BS, D): head h keeps its lanes
    attn_bias = abias_ref[...]        # (NHEAD*BS, BS): 0 / -1e9 batch+pad mask

    # Static unroll over the 2 encoder layers.  For real dino-vitb16 scale,
    # NLAYER would become an "arbitrary" grid axis streaming per-layer weights.
    for l in range(NLAYER):
        vec = lvec_ref[l]                                          # (8, 128)
        ln1g, ln1b = vec[0:1, :D], vec[1:2, :D]
        bqkv = vec[2:3, :3 * D]
        bo = vec[3:4, :D]
        ln2g, ln2b = vec[4:5, :D], vec[5:6, :D]
        b1 = vec[6:7, :MLP]
        b2 = vec[7:8, :D]

        # --- pre-norm multi-head self-attention ---
        h = _layernorm(x, ln1g, ln1b)
        qkv = _mm(h, wqkv_ref[l]) + bqkv                           # (BS, 3D)
        q, k, v = qkv[:, 0:D], qkv[:, D:2 * D], qkv[:, 2 * D:3 * D]

        # Heads along sublanes: row h*BS + r keeps only head h's query lanes,
        # so one dot against full k gives per-(head,row) scores.
        q_exp = jnp.concatenate([q] * NHEAD, axis=0) * kv_mask     # (NHEAD*BS, D)
        s = jax.lax.dot_general(
            q_exp.astype(MXU_DTYPE), k.astype(MXU_DTYPE),
            (((1,), (1,)), ((), ())),
            preferred_element_type=jnp.float32)                    # (NHEAD*BS, BS)
        s = s * ATT_SCALE + attn_bias
        # Row max == per-head / per-batch-block max (robust stabilizer).
        s = s - jnp.max(s, axis=-1, keepdims=True)
        p = jnp.exp(s)
        p = p * pl.reciprocal(jnp.sum(p, axis=-1, keepdims=True), approx=True)

        ctx_exp = _mm(p, v) * kv_mask                              # (NHEAD*BS, D)
        # Collapse heads: aligned sublane slices (offsets multiple of 8).
        ctx = (ctx_exp[0:BS] + ctx_exp[BS:2 * BS]
               + ctx_exp[2 * BS:3 * BS] + ctx_exp[3 * BS:4 * BS])  # (BS, D)
        x = x + _mm(ctx, wo_ref[l]) + bo                           # residual 1

        # --- pre-norm MLP ---
        h2 = _layernorm(x, ln2g, ln2b)
        m = _gelu(_mm(h2, w1_ref[l]) + b1)
        x = x + _mm(m, w2_ref[l]) + b2                             # residual 2

    # ---- final layernorm, masked mean pool, fused classifier heads ----
    fvec = fvec_ref[...]
    lng, lnb = fvec[0:1, :D], fvec[1:2, :D]
    head_b = fvec[2:3, :]

    lhs = _layernorm(x, lng, lnb)                                  # (BS, D)
    scaled = lhs * pool_ref[...]          # pool vec = 1/SEQ on real rows, 0 on pads
    pooled = jnp.concatenate(
        [jnp.sum(scaled[b * SEQ_PAD:(b + 1) * SEQ_PAD], axis=0, keepdims=True)
         for b in range(bsz)], axis=0)                             # (bsz, D) f32

    # Dropout(p=0.5) is identity in eval mode.
    # TODO(synk): training-mode stochastic dropout (pltpu PRNG) not implemented.
    heads = jnp.maximum(_mm(pooled, hw_ref[...]) + head_b, 0.0)    # (bsz, 128)
    pooled_pad = jnp.concatenate(
        [pooled, jnp.zeros((bsz, HEAD_PAD - D), jnp.float32)], axis=-1)
    out_ref[...] = jnp.concatenate([heads, pooled_pad], axis=0)    # (2*bsz, 128)


# ----------------------------- wrapper ----------------------------------------
def _full_spec(a):
    nd = a.ndim
    return pl.BlockSpec(a.shape, lambda i, nd=nd: (0,) * nd)


def _fused_forward(patches_pad, pos_adj, kv_mask, attn_bias, pool_vec, packed, bsz):
    inputs = [patches_pad, packed["pw"], pos_adj, kv_mask, attn_bias, pool_vec,
              packed["wqkv"], packed["wo"], packed["w1"], packed["w2"],
              packed["layer_vecs"], packed["final_vecs"], packed["head_w"]]
    in_specs = [_full_spec(a) for a in inputs]
    out_spec = pl.BlockSpec((2 * bsz, HEAD_PAD), lambda i: (0, 0))
    return pl.pallas_call(
        functools.partial(_vit_fused_kernel, bsz),
        out_shape=jax.ShapeDtypeStruct((2 * bsz, HEAD_PAD), jnp.float32),
        grid=(1,),
        in_specs=in_specs,
        out_specs=out_spec,
        compiler_params=pltpu.CompilerParams(dimension_semantics=("arbitrary",)),
    )(*inputs)


def vit_classifier_forward(x, packed):
    """x: (B, C, IMG, IMG) float32, NCHW; packed: output of pack_params.

    Returns (final_layer1, final_layer2, pooled_output) like the PyTorch module.
    """
    # TODO(synk): ViTImageProcessor / functions.preprocessImage (PIL resize +
    # mean/std normalize) is host-side preprocessing, not a kernel op; input is
    # assumed already preprocessed to (B, C, IMG, IMG).
    bsz, cx, hh, ww = x.shape
    gh, gw = hh // PATCH, ww // PATCH
    # Conv2d(patch, stride=patch) == per-patch matmul with (C, ph, pw)-ordered
    # flattening of the patch, matching the flattened conv weight.
    patches = x.reshape(bsz, cx, gh, PATCH, gw, PATCH)
    patches = patches.transpose(0, 2, 4, 1, 3, 5).reshape(bsz, gh * gw, CPP)
    # Pad sequence to SEQ_PAD: row 0 (CLS slot) and rows SEQ..7 are zero.
    patches_pad = jnp.zeros((bsz, SEQ_PAD, CPP), jnp.float32)
    patches_pad = patches_pad.at[:, 1:1 + NPATCH].set(patches)
    patches_pad = patches_pad.reshape(bsz * SEQ_PAD, CPP)

    pos_adj = jnp.tile(packed["pos_slab"], (bsz, 1))               # (bsz*SEQ_PAD, D)

    # Host-constant masks (numpy; depend only on shapes).
    BS = bsz * SEQ_PAD
    rows = np.arange(NHEAD * BS)
    kv_mask = (rows[:, None] // BS ==
               (np.arange(D) // HDIM)[None, :]).astype(np.float32)     # (NHEAD*BS, D)
    q_b = (rows % BS) // SEQ_PAD
    k_b = np.arange(BS) // SEQ_PAD
    k_t = np.arange(BS) % SEQ_PAD
    valid = (q_b[:, None] == k_b[None, :]) & (k_t[None, :] < SEQ)
    attn_bias = np.where(valid, 0.0, NEG_INF).astype(np.float32)       # (NHEAD*BS, BS)
    pool_vec = np.where((np.arange(BS) % SEQ_PAD) < SEQ,
                        1.0 / SEQ, 0.0).astype(np.float32)[:, None]    # (BS, 1)

    out = _fused_forward(patches_pad, pos_adj,
                         jnp.asarray(kv_mask), jnp.asarray(attn_bias),
                         jnp.asarray(pool_vec), packed, bsz)

    out1 = out[0:bsz, :OUT1]                       # relu(linear1(pooled))
    out2 = out[0:bsz, OUT1:OUT1 + OUT2]            # relu(linear2(pooled))
    pooled = out[bsz:2 * bsz, :D]                  # pooled_output (f32 path)
    return out1, out2, pooled


# ----------------------------- parameters --------------------------------------
def init_params(key):
    def dense(k, shape, scale=0.02):
        return scale * jax.random.normal(k, shape, dtype=jnp.float32)

    keys = iter(jax.random.split(key, 16))
    return {
        "patch_w": dense(next(keys), (CPP, D)),
        "patch_b": jnp.zeros((1, D), jnp.float32),
        "cls": dense(next(keys), (1, D)),
        "pos": dense(next(keys), (SEQ, D)),
        "ln1g": jnp.ones((NLAYER, 1, D), jnp.float32),
        "ln1b": jnp.zeros((NLAYER, 1, D), jnp.float32),
        "wq": dense(next(keys), (NLAYER, D, D)), "bq": jnp.zeros((NLAYER, 1, D), jnp.float32),
        "wk": dense(next(keys), (NLAYER, D, D)), "bk": jnp.zeros((NLAYER, 1, D), jnp.float32),
        "wv": dense(next(keys), (NLAYER, D, D)), "bv": jnp.zeros((NLAYER, 1, D), jnp.float32),
        "wo": dense(next(keys), (NLAYER, D, D)), "bo": jnp.zeros((NLAYER, 1, D), jnp.float32),
        "ln2g": jnp.ones((NLAYER, 1, D), jnp.float32),
        "ln2b": jnp.zeros((NLAYER, 1, D), jnp.float32),
        "w1": dense(next(keys), (NLAYER, D, MLP)), "b1": jnp.zeros((NLAYER, 1, MLP), jnp.float32),
        "w2": dense(next(keys), (NLAYER, MLP, D)), "b2": jnp.zeros((NLAYER, 1, D), jnp.float32),
        "ln_g": jnp.ones((1, D), jnp.float32),
        "ln_b": jnp.zeros((1, D), jnp.float32),
        "head_w1": dense(next(keys), (D, OUT1)), "head_b1": jnp.zeros((1, OUT1), jnp.float32),
        "head_w2": dense(next(keys), (D, OUT2)), "head_b2": jnp.zeros((1, OUT2), jnp.float32),
    }


def pack_params(params):
    """One-time host-side packing: fuse QKV, pack vectors, pre-cast to bf16."""
    bf16 = lambda a: a.astype(jnp.bfloat16)

    wqkv = jnp.concatenate([params["wq"], params["wk"], params["wv"]], axis=-1)
    bqkv = jnp.concatenate([params["bq"], params["bk"], params["bv"]], axis=-1)

    def lane_pad(a):
        return jnp.pad(a, ((0, 0), (0, 0), (0, HEAD_PAD - a.shape[-1])))

    layer_vecs = jnp.concatenate(
        [lane_pad(r) for r in (params["ln1g"], params["ln1b"], bqkv, params["bo"],
                               params["ln2g"], params["ln2b"], params["b1"],
                               params["b2"])], axis=1)             # (NLAYER, 8, 128)

    head_w = jnp.zeros((D, HEAD_PAD), jnp.float32)
    head_w = head_w.at[:, :OUT1].set(params["head_w1"])
    head_w = head_w.at[:, OUT1:OUT1 + OUT2].set(params["head_w2"])
    head_b = jnp.zeros((HEAD_PAD,), jnp.float32)
    head_b = head_b.at[:OUT1].set(params["head_b1"][0])
    head_b = head_b.at[OUT1:OUT1 + OUT2].set(params["head_b2"][0])

    final_vecs = jnp.zeros((8, HEAD_PAD), jnp.float32)
    final_vecs = final_vecs.at[0, :D].set(params["ln_g"][0])
    final_vecs = final_vecs.at[1, :D].set(params["ln_b"][0])
    final_vecs = final_vecs.at[2, :].set(head_b)

    # Additive slab folding CLS token, position embedding and patch bias.
    pos_slab = jnp.zeros((SEQ_PAD, D), jnp.float32)
    pos_slab = pos_slab.at[0].set(params["cls"][0] + params["pos"][0])
    pos_slab = pos_slab.at[1:SEQ].set(params["patch_b"][0] + params["pos"][1:SEQ])

    return {
        "pw": bf16(params["patch_w"]),
        "pos_slab": pos_slab,
        "wqkv": bf16(wqkv),
        "wo": bf16(params["wo"]),
        "w1": bf16(params["w1"]),
        "w2": bf16(params["w2"]),
        "layer_vecs": layer_vecs,
        "final_vecs": final_vecs,
        "head_w": bf16(head_w),
    }


# ----------------------------- main ---------------------------------------------
if __name__ == "__main__":
    key = jax.random.PRNGKey(0)
    kx, kp = jax.random.split(key)
    x = jax.random.normal(kx, (B, C, IMG, IMG), dtype=jnp.float32)
    params = init_params(kp)
    packed = pack_params(params)

    fwd = jax.jit(vit_classifier_forward)
    out1, out2, pooled = fwd(x, packed)
    out1, out2, pooled = jax.block_until_ready((out1, out2, pooled))

    assert out1.shape == (B, OUT1), out1.shape
    assert out2.shape == (B, OUT2), out2.shape
    assert pooled.shape == (B, D), pooled.shape
    assert bool(jnp.all(out1 >= 0.0)) and bool(jnp.all(out2 >= 0.0))   # ReLU outputs
    assert bool(jnp.all(jnp.isfinite(pooled)))
    print("KERNEL_OK")
</pallas_src>

<mosaic_0001>
module attributes {stable_mosaic.version = 11 : i64} {
  func.func @_vit_fused_kernel(%arg0: i32, %arg1: memref<16x192xf32, #tpu.memory_space<vmem>>, %arg2: memref<192x32xbf16, #tpu.memory_space<vmem>>, %arg3: memref<16x32xf32, #tpu.memory_space<vmem>>, %arg4: memref<64x32xf32, #tpu.memory_space<vmem>>, %arg5: memref<64x16xf32, #tpu.memory_space<vmem>>, %arg6: memref<16x1xf32, #tpu.memory_space<vmem>>, %arg7: memref<2x32x96xbf16, #tpu.memory_space<vmem>>, %arg8: memref<2x32x32xbf16, #tpu.memory_space<vmem>>, %arg9: memref<2x32x64xbf16, #tpu.memory_space<vmem>>, %arg10: memref<2x64x32xbf16, #tpu.memory_space<vmem>>, %arg11: memref<2x8x128xf32, #tpu.memory_space<vmem>>, %arg12: memref<8x128xf32, #tpu.memory_space<vmem>>, %arg13: memref<32x128xbf16, #tpu.memory_space<vmem>>, %arg14: memref<4x128xf32, #tpu.memory_space<vmem>>) attributes {dimension_semantics = [#tpu.dimension_semantics<arbitrary>], iteration_bounds = array<i64: 1>, scalar_prefetch = 0 : i64, scratch_operands = 0 : i64, tpu.core_type = #tpu.core_type<tc>, window_params = [{pipeline_mode = #tpu.pipeline_mode<synchronous>, transform_indices = @transform_0, window_bounds = array<i64: 16, 192>}, {pipeline_mode = #tpu.pipeline_mode<synchronous>, transform_indices = @transform_1, window_bounds = array<i64: 192, 32>}, {pipeline_mode = #tpu.pipeline_mode<synchronous>, transform_indices = @transform_2, window_bounds = array<i64: 16, 32>}, {pipeline_mode = #tpu.pipeline_mode<synchronous>, transform_indices = @transform_3, window_bounds = array<i64: 64, 32>}, {pipeline_mode = #tpu.pipeline_mode<synchronous>, transform_indices = @transform_4, window_bounds = array<i64: 64, 16>}, {pipeline_mode = #tpu.pipeline_mode<synchronous>, transform_indices = @transform_5, window_bounds = array<i64: 16, 1>}, {pipeline_mode = #tpu.pipeline_mode<synchronous>, transform_indices = @transform_6, window_bounds = array<i64: 2, 32, 96>}, {pipeline_mode = #tpu.pipeline_mode<synchronous>, transform_indices = @transform_7, window_bounds = array<i64: 2, 32, 32>}, {pipeline_mode = #tpu.pipeline_mode<synchronous>, transform_indices = @transform_8, window_bounds = array<i64: 2, 32, 64>}, {pipeline_mode = #tpu.pipeline_mode<synchronous>, transform_indices = @transform_9, window_bounds = array<i64: 2, 64, 32>}, {pipeline_mode = #tpu.pipeline_mode<synchronous>, transform_indices = @transform_10, window_bounds = array<i64: 2, 8, 128>}, {pipeline_mode = #tpu.pipeline_mode<synchronous>, transform_indices = @transform_11, window_bounds = array<i64: 8, 128>}, {pipeline_mode = #tpu.pipeline_mode<synchronous>, transform_indices = @transform_12, window_bounds = array<i64: 32, 128>}, {pipeline_mode = #tpu.pipeline_mode<synchronous>, transform_indices = @transform_13, window_bounds = array<i64: 4, 128>}]} {
    %c0 = arith.constant 0 : index
    %c0_0 = arith.constant 0 : index
    %0 = vector.load %arg1[%c0, %c0_0] : memref<16x192xf32, #tpu.memory_space<vmem>>, vector<16x192xf32>
    %c0_1 = arith.constant 0 : index
    %c0_2 = arith.constant 0 : index
    %1 = vector.load %arg2[%c0_1, %c0_2] : memref<192x32xbf16, #tpu.memory_space<vmem>>, vector<192x32xbf16>
    %2 = arith.truncf %0 : vector<16x192xf32> to vector<16x192xbf16>
    %cst = arith.constant dense<0.000000e+00> : vector<16x32xf32>
    %3 = tpu.matmul %2, %1, %cst {dimension_numbers = #tpu.dot_dimension_numbers<[1], [0], [0], [1], [0, 0, 1, 1], [], []>} : vector<16x192xbf16>, vector<192x32xbf16>, vector<16x32xf32> -> vector<16x32xf32>
    %c0_3 = arith.constant 0 : index
    %c0_4 = arith.constant 0 : index
    %4 = vector.load %arg3[%c0_3, %c0_4] : memref<16x32xf32, #tpu.memory_space<vmem>>, vector<16x32xf32>
    %5 = arith.addf %3, %4 : vector<16x32xf32>
    %c0_5 = arith.constant 0 : index
    %c0_6 = arith.constant 0 : index
    %6 = vector.load %arg4[%c0_5, %c0_6] : memref<64x32xf32, #tpu.memory_space<vmem>>, vector<64x32xf32>
    %c0_7 = arith.constant 0 : index
    %c0_8 = arith.constant 0 : index
    %7 = vector.load %arg5[%c0_7, %c0_8] : memref<64x16xf32, #tpu.memory_space<vmem>>, vector<64x16xf32>
    %c0_9 = arith.constant 0 : index
    %c0_10 = arith.constant 0 : index
    %c0_11 = arith.constant 0 : index
    %8 = vector.load %arg11[%c0_9, %c0_10, %c0_11] : memref<2x8x128xf32, #tpu.memory_space<vmem>>, vector<1x8x128xf32>
    %9 = vector.shape_cast %8 : vector<1x8x128xf32> to vector<8x128xf32>
    %10 = vector.extract_strided_slice %9 {offsets = [0, 0], sizes = [1, 32], strides = [1, 1]} : vector<8x128xf32> to vector<1x32xf32>
    %11 = vector.extract_strided_slice %9 {offsets = [1, 0], sizes = [1, 32], strides = [1, 1]} : vector<8x128xf32> to vector<1x32xf32>
    %12 = vector.extract_strided_slice %9 {offsets = [2, 0], sizes = [1, 96], strides = [1, 1]} : vector<8x128xf32> to vector<1x96xf32>
    %13 = vector.extract_strided_slice %9 {offsets = [3, 0], sizes = [1, 32], strides = [1, 1]} : vector<8x128xf32> to vector<1x32xf32>
    %14 = vector.extract_strided_slice %9 {offsets = [4, 0], sizes = [1, 32], strides = [1, 1]} : vector<8x128xf32> to vector<1x32xf32>
    %15 = vector.extract_strided_slice %9 {offsets = [5, 0], sizes = [1, 32], strides = [1, 1]} : vector<8x128xf32> to vector<1x32xf32>
    %16 = vector.extract_strided_slice %9 {offsets = [6, 0], sizes = [1, 64], strides = [1, 1]} : vector<8x128xf32> to vector<1x64xf32>
    %17 = vector.extract_strided_slice %9 {offsets = [7, 0], sizes = [1, 32], strides = [1, 1]} : vector<8x128xf32> to vector<1x32xf32>
    %cst_12 = arith.constant dense<0.000000e+00> : vector<16xf32>
    %18 = vector.multi_reduction <add>, %5, %cst_12 [1] : vector<16x32xf32> to vector<16xf32>
    %19 = vector.shape_cast %18 : vector<16xf32> to vector<16x1xf32>
    %cst_13 = arith.constant 3.200000e+01 : f32
    %20 = vector.broadcast %cst_13 : f32 to vector<16x1xf32>
    %21 = arith.divf %19, %20 : vector<16x1xf32>
    %22 = vector.broadcast %21 : vector<16x1xf32> to vector<16x32xf32>
    %23 = arith.subf %5, %22 : vector<16x32xf32>
    %24 = arith.mulf %23, %23 : vector<16x32xf32>
    %cst_14 = arith.constant dense<0.000000e+00> : vector<16xf32>
    %25 = vector.multi_reduction <add>, %24, %cst_14 [1] : vector<16x32xf32> to vector<16xf32>
    %26 = vector.shape_cast %25 : vector<16xf32> to vector<16x1xf32>
    %cst_15 = arith.constant 3.200000e+01 : f32
    %27 = vector.broadcast %cst_15 : f32 to vector<16x1xf32>
    %28 = arith.divf %26, %27 : vector<16x1xf32>
    %29 = vector.broadcast %21 : vector<16x1xf32> to vector<16x32xf32>
    %30 = arith.subf %5, %29 : vector<16x32xf32>
    %cst_16 = arith.constant 9.99999996E-13 : f32
    %31 = vector.broadcast %cst_16 : f32 to vector<16x1xf32>
    %32 = arith.addf %28, %31 : vector<16x1xf32>
    %33 = math.rsqrt %32 : vector<16x1xf32>
    %34 = vector.broadcast %33 : vector<16x1xf32> to vector<16x32xf32>
    %35 = arith.mulf %30, %34 : vector<16x32xf32>
    %36 = vector.broadcast %10 : vector<1x32xf32> to vector<16x32xf32>
    %37 = arith.mulf %35, %36 : vector<16x32xf32>
    %38 = vector.broadcast %11 : vector<1x32xf32> to vector<16x32xf32>
    %39 = arith.addf %37, %38 : vector<16x32xf32>
    %c0_17 = arith.constant 0 : index
    %c0_18 = arith.constant 0 : index
    %c0_19 = arith.constant 0 : index
    %40 = vector.load %arg7[%c0_17, %c0_18, %c0_19] : memref<2x32x96xbf16, #tpu.memory_space<vmem>>, vector<1x32x96xbf16>
    %41 = vector.shape_cast %40 : vector<1x32x96xbf16> to vector<32x96xbf16>
    %42 = arith.truncf %39 : vector<16x32xf32> to vector<16x32xbf16>
    %cst_20 = arith.constant dense<0.000000e+00> : vector<16x96xf32>
    %43 = tpu.matmul %42, %41, %cst_20 {dimension_numbers = #tpu.dot_dimension_numbers<[1], [0], [0], [1], [0, 0, 1, 1], [], []>} : vector<16x32xbf16>, vector<32x96xbf16>, vector<16x96xf32> -> vector<16x96xf32>
    %44 = vector.broadcast %12 : vector<1x96xf32> to vector<16x96xf32>
    %45 = arith.addf %43, %44 : vector<16x96xf32>
    %46 = vector.extract_strided_slice %45 {offsets = [0, 0], sizes = [16, 32], strides = [1, 1]} : vector<16x96xf32> to vector<16x32xf32>
    %47 = vector.extract_strided_slice %45 {offsets = [0, 32], sizes = [16, 32], strides = [1, 1]} : vector<16x96xf32> to vector<16x32xf32>
    %48 = vector.extract_strided_slice %45 {offsets = [0, 64], sizes = [16, 32], strides = [1, 1]} : vector<16x96xf32> to vector<16x32xf32>
    %49 = tpu.concatenate %46, %46, %46, %46 in 0 : vector<16x32xf32>, vector<16x32xf32>, vector<16x32xf32>, vector<16x32xf32> -> vector<64x32xf32>
    %50 = arith.mulf %49, %6 : vector<64x32xf32>
    %51 = arith.truncf %50 : vector<64x32xf32> to vector<64x32xbf16>
    %52 = arith.truncf %47 : vector<16x32xf32> to vector<16x32xbf16>
    %cst_21 = arith.constant dense<0.000000e+00> : vector<64x16xf32>
    %53 = tpu.matmul %51, %52, %cst_21 {dimension_numbers = #tpu.dot_dimension_numbers<[1], [1], [0], [0], [0, 0, 1, 0], [], []>} : vector<64x32xbf16>, vector<16x32xbf16>, vector<64x16xf32> -> vector<64x16xf32>
    %cst_22 = arith.constant 0.353553385 : f32
    %54 = vector.broadcast %cst_22 : f32 to vector<64x16xf32>
    %55 = arith.mulf %53, %54 : vector<64x16xf32>
    %56 = arith.addf %55, %7 : vector<64x16xf32>
    %cst_23 = arith.constant dense<0xFF800000> : vector<64xf32>
    %57 = vector.multi_reduction <maximumf>, %56, %cst_23 [1] : vector<64x16xf32> to vector<64xf32>
    %58 = vector.shape_cast %57 : vector<64xf32> to vector<64x1xf32>
    %59 = vector.broadcast %58 : vector<64x1xf32> to vector<64x16xf32>
    %60 = arith.subf %56, %59 : vector<64x16xf32>
    %61 = math.exp %60 : vector<64x16xf32>
    %cst_24 = arith.constant dense<0.000000e+00> : vector<64xf32>
    %62 = vector.multi_reduction <add>, %61, %cst_24 [1] : vector<64x16xf32> to vector<64xf32>
    %63 = vector.shape_cast %62 : vector<64xf32> to vector<64x1xf32>
    %64 = tpu.reciprocal %63 {approx = true} : vector<64x1xf32> -> vector<64x1xf32>
    %65 = vector.broadcast %64 : vector<64x1xf32> to vector<64x16xf32>
    %66 = arith.mulf %61, %65 : vector<64x16xf32>
    %67 = arith.truncf %66 : vector<64x16xf32> to vector<64x16xbf16>
    %68 = arith.truncf %48 : vector<16x32xf32> to vector<16x32xbf16>
    %cst_25 = arith.constant dense<0.000000e+00> : vector<64x32xf32>
    %69 = tpu.matmul %67, %68, %cst_25 {dimension_numbers = #tpu.dot_dimension_numbers<[1], [0], [0], [1], [0, 0, 1, 1], [], []>} : vector<64x16xbf16>, vector<16x32xbf16>, vector<64x32xf32> -> vector<64x32xf32>
    %70 = arith.mulf %69, %6 : vector<64x32xf32>
    %71 = vector.extract_strided_slice %70 {offsets = [0, 0], sizes = [16, 32], strides = [1, 1]} : vector<64x32xf32> to vector<16x32xf32>
    %72 = vector.extract_strided_slice %70 {offsets = [16, 0], sizes = [16, 32], strides = [1, 1]} : vector<64x32xf32> to vector<16x32xf32>
    %73 = arith.addf %71, %72 : vector<16x32xf32>
    %74 = vector.extract_strided_slice %70 {offsets = [32, 0], sizes = [16, 32], strides = [1, 1]} : vector<64x32xf32> to vector<16x32xf32>
    %75 = arith.addf %73, %74 : vector<16x32xf32>
    %76 = vector.extract_strided_slice %70 {offsets = [48, 0], sizes = [16, 32], strides = [1, 1]} : vector<64x32xf32> to vector<16x32xf32>
    %77 = arith.addf %75, %76 : vector<16x32xf32>
    %c0_26 = arith.constant 0 : index
    %c0_27 = arith.constant 0 : index
    %c0_28 = arith.constant 0 : index
    %78 = vector.load %arg8[%c0_26, %c0_27, %c0_28] : memref<2x32x32xbf16, #tpu.memory_space<vmem>>, vector<1x32x32xbf16>
    %79 = vector.shape_cast %78 : vector<1x32x32xbf16> to vector<32x32xbf16>
    %80 = arith.truncf %77 : vector<16x32xf32> to vector<16x32xbf16>
    %cst_29 = arith.constant dense<0.000000e+00> : vector<16x32xf32>
    %81 = tpu.matmul %80, %79, %cst_29 {dimension_numbers = #tpu.dot_dimension_numbers<[1], [0], [0], [1], [0, 0, 1, 1], [], []>} : vector<16x32xbf16>, vector<32x32xbf16>, vector<16x32xf32> -> vector<16x32xf32>
    %82 = arith.addf %5, %81 : vector<16x32xf32>
    %83 = vector.broadcast %13 : vector<1x32xf32> to vector<16x32xf32>
    %84 = arith.addf %82, %83 : vector<16x32xf32>
    %cst_30 = arith.constant dense<0.000000e+00> : vector<16xf32>
    %85 = vector.multi_reduction <add>, %84, %cst_30 [1] : vector<16x32xf32> to vector<16xf32>
    %86 = vector.shape_cast %85 : vector<16xf32> to vector<16x1xf32>
    %cst_31 = arith.constant 3.200000e+01 : f32
    %87 = vector.broadcast %cst_31 : f32 to vector<16x1xf32>
    %88 = arith.divf %86, %87 : vector<16x1xf32>
    %89 = vector.broadcast %88 : vector<16x1xf32> to vector<16x32xf32>
    %90 = arith.subf %84, %89 : vector<16x32xf32>
    %91 = arith.mulf %90, %90 : vector<16x32xf32>
    %cst_32 = arith.constant dense<0.000000e+00> : vector<16xf32>
    %92 = vector.multi_reduction <add>, %91, %cst_32 [1] : vector<16x32xf32> to vector<16xf32>
    %93 = vector.shape_cast %92 : vector<16xf32> to vector<16x1xf32>
    %cst_33 = arith.constant 3.200000e+01 : f32
    %94 = vector.broadcast %cst_33 : f32 to vector<16x1xf32>
    %95 = arith.divf %93, %94 : vector<16x1xf32>
    %96 = vector.broadcast %88 : vector<16x1xf32> to vector<16x32xf32>
    %97 = arith.subf %84, %96 : vector<16x32xf32>
    %cst_34 = arith.constant 9.99999996E-13 : f32
    %98 = vector.broadcast %cst_34 : f32 to vector<16x1xf32>
    %99 = arith.addf %95, %98 : vector<16x1xf32>
    %100 = math.rsqrt %99 : vector<16x1xf32>
    %101 = vector.broadcast %100 : vector<16x1xf32> to vector<16x32xf32>
    %102 = arith.mulf %97, %101 : vector<16x32xf32>
    %103 = vector.broadcast %14 : vector<1x32xf32> to vector<16x32xf32>
    %104 = arith.mulf %102, %103 : vector<16x32xf32>
    %105 = vector.broadcast %15 : vector<1x32xf32> to vector<16x32xf32>
    %106 = arith.addf %104, %105 : vector<16x32xf32>
    %c0_35 = arith.constant 0 : index
    %c0_36 = arith.constant 0 : index
    %c0_37 = arith.constant 0 : index
    %107 = vector.load %arg9[%c0_35, %c0_36, %c0_37] : memref<2x32x64xbf16, #tpu.memory_space<vmem>>, vector<1x32x64xbf16>
    %108 = vector.shape_cast %107 : vector<1x32x64xbf16> to vector<32x64xbf16>
    %109 = arith.truncf %106 : vector<16x32xf32> to vector<16x32xbf16>
    %cst_38 = arith.constant dense<0.000000e+00> : vector<16x64xf32>
    %110 = tpu.matmul %109, %108, %cst_38 {dimension_numbers = #tpu.dot_dimension_numbers<[1], [0], [0], [1], [0, 0, 1, 1], [], []>} : vector<16x32xbf16>, vector<32x64xbf16>, vector<16x64xf32> -> vector<16x64xf32>
    %111 = vector.broadcast %16 : vector<1x64xf32> to vector<16x64xf32>
    %112 = arith.addf %110, %111 : vector<16x64xf32>
    %cst_39 = arith.constant 5.000000e-01 : f32
    %113 = vector.broadcast %cst_39 : f32 to vector<16x64xf32>
    %114 = arith.mulf %113, %112 : vector<16x64xf32>
    %cst_40 = arith.constant 0.707106769 : f32
    %115 = vector.broadcast %cst_40 : f32 to vector<16x64xf32>
    %116 = arith.mulf %112, %115 : vector<16x64xf32>
    %cst_41 = arith.constant 0.000000e+00 : f32
    %117 = vector.broadcast %cst_41 : f32 to vector<16x64xf32>
    %118 = arith.subf %117, %116 : vector<16x64xf32>
    %119 = arith.maximumf %116, %118 : vector<16x64xf32>
    %cst_42 = arith.constant 0.327591091 : f32
    %120 = vector.broadcast %cst_42 : f32 to vector<16x64xf32>
    %121 = arith.mulf %120, %119 : vector<16x64xf32>
    %cst_43 = arith.constant 1.000000e+00 : f32
    %122 = vector.broadcast %cst_43 : f32 to vector<16x64xf32>
    %123 = arith.addf %122, %121 : vector<16x64xf32>
    %cst_44 = arith.constant 1.000000e+00 : f32
    %124 = vector.broadcast %cst_44 : f32 to vector<16x64xf32>
    %125 = arith.divf %124, %123 : vector<16x64xf32>
    %cst_45 = arith.constant 1.06140542 : f32
    %126 = vector.broadcast %cst_45 : f32 to vector<16x64xf32>
    %127 = arith.mulf %126, %125 : vector<16x64xf32>
    %cst_46 = arith.constant -1.45315206 : f32
    %128 = vector.broadcast %cst_46 : f32 to vector<16x64xf32>
    %129 = arith.addf %127, %128 : vector<16x64xf32>
    %130 = arith.mulf %129, %125 : vector<16x64xf32>
    %cst_47 = arith.constant 1.42141378 : f32
    %131 = vector.broadcast %cst_47 : f32 to vector<16x64xf32>
    %132 = arith.addf %130, %131 : vector<16x64xf32>
    %133 = arith.mulf %132, %125 : vector<16x64xf32>
    %cst_48 = arith.constant -0.284496725 : f32
    %134 = vector.broadcast %cst_48 : f32 to vector<16x64xf32>
    %135 = arith.addf %133, %134 : vector<16x64xf32>
    %136 = arith.mulf %135, %125 : vector<16x64xf32>
    %cst_49 = arith.constant 0.254829586 : f32
    %137 = vector.broadcast %cst_49 : f32 to vector<16x64xf32>
    %138 = arith.addf %136, %137 : vector<16x64xf32>
    %139 = arith.mulf %138, %125 : vector<16x64xf32>
    %cst_50 = arith.constant 0.000000e+00 : f32
    %140 = vector.broadcast %cst_50 : f32 to vector<16x64xf32>
    %141 = arith.subf %140, %119 : vector<16x64xf32>
    %142 = arith.mulf %141, %119 : vector<16x64xf32>
    %143 = math.exp %142 : vector<16x64xf32>
    %144 = arith.mulf %139, %143 : vector<16x64xf32>
    %cst_51 = arith.constant 1.000000e+00 : f32
    %145 = vector.broadcast %cst_51 : f32 to vector<16x64xf32>
    %146 = arith.subf %145, %144 : vector<16x64xf32>
    %cst_52 = arith.constant 0.000000e+00 : f32
    %147 = vector.broadcast %cst_52 : f32 to vector<16x64xf32>
    %148 = arith.cmpf oge, %116, %147 : vector<16x64xf32>
    %cst_53 = arith.constant 0.000000e+00 : f32
    %149 = vector.broadcast %cst_53 : f32 to vector<16x64xf32>
    %150 = arith.subf %149, %146 : vector<16x64xf32>
    %151 = arith.select %148, %146, %150 : vector<16x64xi1>, vector<16x64xf32>
    %cst_54 = arith.constant 1.000000e+00 : f32
    %152 = vector.broadcast %cst_54 : f32 to vector<16x64xf32>
    %153 = arith.addf %152, %151 : vector<16x64xf32>
    %154 = arith.mulf %114, %153 : vector<16x64xf32>
    %c0_55 = arith.constant 0 : index
    %c0_56 = arith.constant 0 : index
    %c0_57 = arith.constant 0 : index
    %155 = vector.load %arg10[%c0_55, %c0_56, %c0_57] : memref<2x64x32xbf16, #tpu.memory_space<vmem>>, vector<1x64x32xbf16>
    %156 = vector.shape_cast %155 : vector<1x64x32xbf16> to vector<64x32xbf16>
    %157 = arith.truncf %154 : vector<16x64xf32> to vector<16x64xbf16>
    %cst_58 = arith.constant dense<0.000000e+00> : vector<16x32xf32>
    %158 = tpu.matmul %157, %156, %cst_58 {dimension_numbers = #tpu.dot_dimension_numbers<[1], [0], [0], [1], [0, 0, 1, 1], [], []>} : vector<16x64xbf16>, vector<64x32xbf16>, vector<16x32xf32> -> vector<16x32xf32>
    %159 = arith.addf %84, %158 : vector<16x32xf32>
    %160 = vector.broadcast %17 : vector<1x32xf32> to vector<16x32xf32>
    %161 = arith.addf %159, %160 : vector<16x32xf32>
    %c1 = arith.constant 1 : index
    %c0_59 = arith.constant 0 : index
    %c0_60 = arith.constant 0 : index
    %162 = vector.load %arg11[%c1, %c0_59, %c0_60] : memref<2x8x128xf32, #tpu.memory_space<vmem>>, vector<1x8x128xf32>
    %163 = vector.shape_cast %162 : vector<1x8x128xf32> to vector<8x128xf32>
    %164 = vector.extract_strided_slice %163 {offsets = [0, 0], sizes = [1, 32], strides = [1, 1]} : vector<8x128xf32> to vector<1x32xf32>
    %165 = vector.extract_strided_slice %163 {offsets = [1, 0], sizes = [1, 32], strides = [1, 1]} : vector<8x128xf32> to vector<1x32xf32>
    %166 = vector.extract_strided_slice %163 {offsets = [2, 0], sizes = [1, 96], strides = [1, 1]} : vector<8x128xf32> to vector<1x96xf32>
    %167 = vector.extract_strided_slice %163 {offsets = [3, 0], sizes = [1, 32], strides = [1, 1]} : vector<8x128xf32> to vector<1x32xf32>
    %168 = vector.extract_strided_slice %163 {offsets = [4, 0], sizes = [1, 32], strides = [1, 1]} : vector<8x128xf32> to vector<1x32xf32>
    %169 = vector.extract_strided_slice %163 {offsets = [5, 0], sizes = [1, 32], strides = [1, 1]} : vector<8x128xf32> to vector<1x32xf32>
    %170 = vector.extract_strided_slice %163 {offsets = [6, 0], sizes = [1, 64], strides = [1, 1]} : vector<8x128xf32> to vector<1x64xf32>
    %171 = vector.extract_strided_slice %163 {offsets = [7, 0], sizes = [1, 32], strides = [1, 1]} : vector<8x128xf32> to vector<1x32xf32>
    %cst_61 = arith.constant dense<0.000000e+00> : vector<16xf32>
    %172 = vector.multi_reduction <add>, %161, %cst_61 [1] : vector<16x32xf32> to vector<16xf32>
    %173 = vector.shape_cast %172 : vector<16xf32> to vector<16x1xf32>
    %cst_62 = arith.constant 3.200000e+01 : f32
    %174 = vector.broadcast %cst_62 : f32 to vector<16x1xf32>
    %175 = arith.divf %173, %174 : vector<16x1xf32>
    %176 = vector.broadcast %175 : vector<16x1xf32> to vector<16x32xf32>
    %177 = arith.subf %161, %176 : vector<16x32xf32>
    %178 = arith.mulf %177, %177 : vector<16x32xf32>
    %cst_63 = arith.constant dense<0.000000e+00> : vector<16xf32>
    %179 = vector.multi_reduction <add>, %178, %cst_63 [1] : vector<16x32xf32> to vector<16xf32>
    %180 = vector.shape_cast %179 : vector<16xf32> to vector<16x1xf32>
    %cst_64 = arith.constant 3.200000e+01 : f32
    %181 = vector.broadcast %cst_64 : f32 to vector<16x1xf32>
    %182 = arith.divf %180, %181 : vector<16x1xf32>
    %183 = vector.broadcast %175 : vector<16x1xf32> to vector<16x32xf32>
    %184 = arith.subf %161, %183 : vector<16x32xf32>
    %cst_65 = arith.constant 9.99999996E-13 : f32
    %185 = vector.broadcast %cst_65 : f32 to vector<16x1xf32>
    %186 = arith.addf %182, %185 : vector<16x1xf32>
    %187 = math.rsqrt %186 : vector<16x1xf32>
    %188 = vector.broadcast %187 : vector<16x1xf32> to vector<16x32xf32>
    %189 = arith.mulf %184, %188 : vector<16x32xf32>
    %190 = vector.broadcast %164 : vector<1x32xf32> to vector<16x32xf32>
    %191 = arith.mulf %189, %190 : vector<16x32xf32>
    %192 = vector.broadcast %165 : vector<1x32xf32> to vector<16x32xf32>
    %193 = arith.addf %191, %192 : vector<16x32xf32>
    %c1_66 = arith.constant 1 : index
    %c0_67 = arith.constant 0 : index
    %c0_68 = arith.constant 0 : index
    %194 = vector.load %arg7[%c1_66, %c0_67, %c0_68] : memref<2x32x96xbf16, #tpu.memory_space<vmem>>, vector<1x32x96xbf16>
    %195 = vector.shape_cast %194 : vector<1x32x96xbf16> to vector<32x96xbf16>
    %196 = arith.truncf %193 : vector<16x32xf32> to vector<16x32xbf16>
    %cst_69 = arith.constant dense<0.000000e+00> : vector<16x96xf32>
    %197 = tpu.matmul %196, %195, %cst_69 {dimension_numbers = #tpu.dot_dimension_numbers<[1], [0], [0], [1], [0, 0, 1, 1], [], []>} : vector<16x32xbf16>, vector<32x96xbf16>, vector<16x96xf32> -> vector<16x96xf32>
    %198 = vector.broadcast %166 : vector<1x96xf32> to vector<16x96xf32>
    %199 = arith.addf %197, %198 : vector<16x96xf32>
    %200 = vector.extract_strided_slice %199 {offsets = [0, 0], sizes = [16, 32], strides = [1, 1]} : vector<16x96xf32> to vector<16x32xf32>
    %201 = vector.extract_strided_slice %199 {offsets = [0, 32], sizes = [16, 32], strides = [1, 1]} : vector<16x96xf32> to vector<16x32xf32>
    %202 = vector.extract_strided_slice %199 {offsets = [0, 64], sizes = [16, 32], strides = [1, 1]} : vector<16x96xf32> to vector<16x32xf32>
    %203 = tpu.concatenate %200, %200, %200, %200 in 0 : vector<16x32xf32>, vector<16x32xf32>, vector<16x32xf32>, vector<16x32xf32> -> vector<64x32xf32>
    %204 = arith.mulf %203, %6 : vector<64x32xf32>
    %205 = arith.truncf %204 : vector<64x32xf32> to vector<64x32xbf16>
    %206 = arith.truncf %201 : vector<16x32xf32> to vector<16x32xbf16>
    %cst_70 = arith.constant dense<0.000000e+00> : vector<64x16xf32>
    %207 = tpu.matmul %205, %206, %cst_70 {dimension_numbers = #tpu.dot_dimension_numbers<[1], [1], [0], [0], [0, 0, 1, 0], [], []>} : vector<64x32xbf16>, vector<16x32xbf16>, vector<64x16xf32> -> vector<64x16xf32>
    %cst_71 = arith.constant 0.353553385 : f32
    %208 = vector.broadcast %cst_71 : f32 to vector<64x16xf32>
    %209 = arith.mulf %207, %208 : vector<64x16xf32>
    %210 = arith.addf %209, %7 : vector<64x16xf32>
    %cst_72 = arith.constant dense<0xFF800000> : vector<64xf32>
    %211 = vector.multi_reduction <maximumf>, %210, %cst_72 [1] : vector<64x16xf32> to vector<64xf32>
    %212 = vector.shape_cast %211 : vector<64xf32> to vector<64x1xf32>
    %213 = vector.broadcast %212 : vector<64x1xf32> to vector<64x16xf32>
    %214 = arith.subf %210, %213 : vector<64x16xf32>
    %215 = math.exp %214 : vector<64x16xf32>
    %cst_73 = arith.constant dense<0.000000e+00> : vector<64xf32>
    %216 = vector.multi_reduction <add>, %215, %cst_73 [1] : vector<64x16xf32> to vector<64xf32>
    %217 = vector.shape_cast %216 : vector<64xf32> to vector<64x1xf32>
    %218 = tpu.reciprocal %217 {approx = true} : vector<64x1xf32> -> vector<64x1xf32>
    %219 = vector.broadcast %218 : vector<64x1xf32> to vector<64x16xf32>
    %220 = arith.mulf %215, %219 : vector<64x16xf32>
    %221 = arith.truncf %220 : vector<64x16xf32> to vector<64x16xbf16>
    %222 = arith.truncf %202 : vector<16x32xf32> to vector<16x32xbf16>
    %cst_74 = arith.constant dense<0.000000e+00> : vector<64x32xf32>
    %223 = tpu.matmul %221, %222, %cst_74 {dimension_numbers = #tpu.dot_dimension_numbers<[1], [0], [0], [1], [0, 0, 1, 1], [], []>} : vector<64x16xbf16>, vector<16x32xbf16>, vector<64x32xf32> -> vector<64x32xf32>
    %224 = arith.mulf %223, %6 : vector<64x32xf32>
    %225 = vector.extract_strided_slice %224 {offsets = [0, 0], sizes = [16, 32], strides = [1, 1]} : vector<64x32xf32> to vector<16x32xf32>
    %226 = vector.extract_strided_slice %224 {offsets = [16, 0], sizes = [16, 32], strides = [1, 1]} : vector<64x32xf32> to vector<16x32xf32>
    %227 = arith.addf %225, %226 : vector<16x32xf32>
    %228 = vector.extract_strided_slice %224 {offsets = [32, 0], sizes = [16, 32], strides = [1, 1]} : vector<64x32xf32> to vector<16x32xf32>
    %229 = arith.addf %227, %228 : vector<16x32xf32>
    %230 = vector.extract_strided_slice %224 {offsets = [48, 0], sizes = [16, 32], strides = [1, 1]} : vector<64x32xf32> to vector<16x32xf32>
    %231 = arith.addf %229, %230 : vector<16x32xf32>
    %c1_75 = arith.constant 1 : index
    %c0_76 = arith.constant 0 : index
    %c0_77 = arith.constant 0 : index
    %232 = vector.load %arg8[%c1_75, %c0_76, %c0_77] : memref<2x32x32xbf16, #tpu.memory_space<vmem>>, vector<1x32x32xbf16>
    %233 = vector.shape_cast %232 : vector<1x32x32xbf16> to vector<32x32xbf16>
    %234 = arith.truncf %231 : vector<16x32xf32> to vector<16x32xbf16>
    %cst_78 = arith.constant dense<0.000000e+00> : vector<16x32xf32>
    %235 = tpu.matmul %234, %233, %cst_78 {dimension_numbers = #tpu.dot_dimension_numbers<[1], [0], [0], [1], [0, 0, 1, 1], [], []>} : vector<16x32xbf16>, vector<32x32xbf16>, vector<16x32xf32> -> vector<16x32xf32>
    %236 = arith.addf %161, %235 : vector<16x32xf32>
    %237 = vector.broadcast %167 : vector<1x32xf32> to vector<16x32xf32>
    %238 = arith.addf %236, %237 : vector<16x32xf32>
    %cst_79 = arith.constant dense<0.000000e+00> : vector<16xf32>
    %239 = vector.multi_reduction <add>, %238, %cst_79 [1] : vector<16x32xf32> to vector<16xf32>
    %240 = vector.shape_cast %239 : vector<16xf32> to vector<16x1xf32>
    %cst_80 = arith.constant 3.200000e+01 : f32
    %241 = vector.broadcast %cst_80 : f32 to vector<16x1xf32>
    %242 = arith.divf %240, %241 : vector<16x1xf32>
    %243 = vector.broadcast %242 : vector<16x1xf32> to vector<16x32xf32>
    %244 = arith.subf %238, %243 : vector<16x32xf32>
    %245 = arith.mulf %244, %244 : vector<16x32xf32>
    %cst_81 = arith.constant dense<0.000000e+00> : vector<16xf32>
    %246 = vector.multi_reduction <add>, %245, %cst_81 [1] : vector<16x32xf32> to vector<16xf32>
    %247 = vector.shape_cast %246 : vector<16xf32> to vector<16x1xf32>
    %cst_82 = arith.constant 3.200000e+01 : f32
    %248 = vector.broadcast %cst_82 : f32 to vector<16x1xf32>
    %249 = arith.divf %247, %248 : vector<16x1xf32>
    %250 = vector.broadcast %242 : vector<16x1xf32> to vector<16x32xf32>
    %251 = arith.subf %238, %250 : vector<16x32xf32>
    %cst_83 = arith.constant 9.99999996E-13 : f32
    %252 = vector.broadcast %cst_83 : f32 to vector<16x1xf32>
    %253 = arith.addf %249, %252 : vector<16x1xf32>
    %254 = math.rsqrt %253 : vector<16x1xf32>
    %255 = vector.broadcast %254 : vector<16x1xf32> to vector<16x32xf32>
    %256 = arith.mulf %251, %255 : vector<16x32xf32>
    %257 = vector.broadcast %168 : vector<1x32xf32> to vector<16x32xf32>
    %258 = arith.mulf %256, %257 : vector<16x32xf32>
    %259 = vector.broadcast %169 : vector<1x32xf32> to vector<16x32xf32>
    %260 = arith.addf %258, %259 : vector<16x32xf32>
    %c1_84 = arith.constant 1 : index
    %c0_85 = arith.constant 0 : index
    %c0_86 = arith.constant 0 : index
    %261 = vector.load %arg9[%c1_84, %c0_85, %c0_86] : memref<2x32x64xbf16, #tpu.memory_space<vmem>>, vector<1x32x64xbf16>
    %262 = vector.shape_cast %261 : vector<1x32x64xbf16> to vector<32x64xbf16>
    %263 = arith.truncf %260 : vector<16x32xf32> to vector<16x32xbf16>
    %cst_87 = arith.constant dense<0.000000e+00> : vector<16x64xf32>
    %264 = tpu.matmul %263, %262, %cst_87 {dimension_numbers = #tpu.dot_dimension_numbers<[1], [0], [0], [1], [0, 0, 1, 1], [], []>} : vector<16x32xbf16>, vector<32x64xbf16>, vector<16x64xf32> -> vector<16x64xf32>
    %265 = vector.broadcast %170 : vector<1x64xf32> to vector<16x64xf32>
    %266 = arith.addf %264, %265 : vector<16x64xf32>
    %cst_88 = arith.constant 5.000000e-01 : f32
    %267 = vector.broadcast %cst_88 : f32 to vector<16x64xf32>
    %268 = arith.mulf %267, %266 : vector<16x64xf32>
    %cst_89 = arith.constant 0.707106769 : f32
    %269 = vector.broadcast %cst_89 : f32 to vector<16x64xf32>
    %270 = arith.mulf %266, %269 : vector<16x64xf32>
    %cst_90 = arith.constant 0.000000e+00 : f32
    %271 = vector.broadcast %cst_90 : f32 to vector<16x64xf32>
    %272 = arith.subf %271, %270 : vector<16x64xf32>
    %273 = arith.maximumf %270, %272 : vector<16x64xf32>
    %cst_91 = arith.constant 0.327591091 : f32
    %274 = vector.broadcast %cst_91 : f32 to vector<16x64xf32>
    %275 = arith.mulf %274, %273 : vector<16x64xf32>
    %cst_92 = arith.constant 1.000000e+00 : f32
    %276 = vector.broadcast %cst_92 : f32 to vector<16x64xf32>
    %277 = arith.addf %276, %275 : vector<16x64xf32>
    %cst_93 = arith.constant 1.000000e+00 : f32
    %278 = vector.broadcast %cst_93 : f32 to vector<16x64xf32>
    %279 = arith.divf %278, %277 : vector<16x64xf32>
    %cst_94 = arith.constant 1.06140542 : f32
    %280 = vector.broadcast %cst_94 : f32 to vector<16x64xf32>
    %281 = arith.mulf %280, %279 : vector<16x64xf32>
    %cst_95 = arith.constant -1.45315206 : f32
    %282 = vector.broadcast %cst_95 : f32 to vector<16x64xf32>
    %283 = arith.addf %281, %282 : vector<16x64xf32>
    %284 = arith.mulf %283, %279 : vector<16x64xf32>
    %cst_96 = arith.constant 1.42141378 : f32
    %285 = vector.broadcast %cst_96 : f32 to vector<16x64xf32>
    %286 = arith.addf %284, %285 : vector<16x64xf32>
    %287 = arith.mulf %286, %279 : vector<16x64xf32>
    %cst_97 = arith.constant -0.284496725 : f32
    %288 = vector.broadcast %cst_97 : f32 to vector<16x64xf32>
    %289 = arith.addf %287, %288 : vector<16x64xf32>
    %290 = arith.mulf %289, %279 : vector<16x64xf32>
    %cst_98 = arith.constant 0.254829586 : f32
    %291 = vector.broadcast %cst_98 : f32 to vector<16x64xf32>
    %292 = arith.addf %290, %291 : vector<16x64xf32>
    %293 = arith.mulf %292, %279 : vector<16x64xf32>
    %cst_99 = arith.constant 0.000000e+00 : f32
    %294 = vector.broadcast %cst_99 : f32 to vector<16x64xf32>
    %295 = arith.subf %294, %273 : vector<16x64xf32>
    %296 = arith.mulf %295, %273 : vector<16x64xf32>
    %297 = math.exp %296 : vector<16x64xf32>
    %298 = arith.mulf %293, %297 : vector<16x64xf32>
    %cst_100 = arith.constant 1.000000e+00 : f32
    %299 = vector.broadcast %cst_100 : f32 to vector<16x64xf32>
    %300 = arith.subf %299, %298 : vector<16x64xf32>
    %cst_101 = arith.constant 0.000000e+00 : f32
    %301 = vector.broadcast %cst_101 : f32 to vector<16x64xf32>
    %302 = arith.cmpf oge, %270, %301 : vector<16x64xf32>
    %cst_102 = arith.constant 0.000000e+00 : f32
    %303 = vector.broadcast %cst_102 : f32 to vector<16x64xf32>
    %304 = arith.subf %303, %300 : vector<16x64xf32>
    %305 = arith.select %302, %300, %304 : vector<16x64xi1>, vector<16x64xf32>
    %cst_103 = arith.constant 1.000000e+00 : f32
    %306 = vector.broadcast %cst_103 : f32 to vector<16x64xf32>
    %307 = arith.addf %306, %305 : vector<16x64xf32>
    %308 = arith.mulf %268, %307 : vector<16x64xf32>
    %c1_104 = arith.constant 1 : index
    %c0_105 = arith.constant 0 : index
    %c0_106 = arith.constant 0 : index
    %309 = vector.load %arg10[%c1_104, %c0_105, %c0_106] : memref<2x64x32xbf16, #tpu.memory_space<vmem>>, vector<1x64x32xbf16>
    %310 = vector.shape_cast %309 : vector<1x64x32xbf16> to vector<64x32xbf16>
    %311 = arith.truncf %308 : vector<16x64xf32> to vector<16x64xbf16>
    %cst_107 = arith.constant dense<0.000000e+00> : vector<16x32xf32>
    %312 = tpu.matmul %311, %310, %cst_107 {dimension_numbers = #tpu.dot_dimension_numbers<[1], [0], [0], [1], [0, 0, 1, 1], [], []>} : vector<16x64xbf16>, vector<64x32xbf16>, vector<16x32xf32> -> vector<16x32xf32>
    %313 = arith.addf %238, %312 : vector<16x32xf32>
    %314 = vector.broadcast %171 : vector<1x32xf32> to vector<16x32xf32>
    %315 = arith.addf %313, %314 : vector<16x32xf32>
    %c0_108 = arith.constant 0 : index
    %c0_109 = arith.constant 0 : index
    %316 = vector.load %arg12[%c0_108, %c0_109] : memref<8x128xf32, #tpu.memory_space<vmem>>, vector<8x128xf32>
    %317 = vector.extract_strided_slice %316 {offsets = [0, 0], sizes = [1, 32], strides = [1, 1]} : vector<8x128xf32> to vector<1x32xf32>
    %318 = vector.extract_strided_slice %316 {offsets = [1, 0], sizes = [1, 32], strides = [1, 1]} : vector<8x128xf32> to vector<1x32xf32>
    %319 = vector.extract_strided_slice %316 {offsets = [2, 0], sizes = [1, 128], strides = [1, 1]} : vector<8x128xf32> to vector<1x128xf32>
    %cst_110 = arith.constant dense<0.000000e+00> : vector<16xf32>
    %320 = vector.multi_reduction <add>, %315, %cst_110 [1] : vector<16x32xf32> to vector<16xf32>
    %321 = vector.shape_cast %320 : vector<16xf32> to vector<16x1xf32>
    %cst_111 = arith.constant 3.200000e+01 : f32
    %322 = vector.broadcast %cst_111 : f32 to vector<16x1xf32>
    %323 = arith.divf %321, %322 : vector<16x1xf32>
    %324 = vector.broadcast %323 : vector<16x1xf32> to vector<16x32xf32>
    %325 = arith.subf %315, %324 : vector<16x32xf32>
    %326 = arith.mulf %325, %325 : vector<16x32xf32>
    %cst_112 = arith.constant dense<0.000000e+00> : vector<16xf32>
    %327 = vector.multi_reduction <add>, %326, %cst_112 [1] : vector<16x32xf32> to vector<16xf32>
    %328 = vector.shape_cast %327 : vector<16xf32> to vector<16x1xf32>
    %cst_113 = arith.constant 3.200000e+01 : f32
    %329 = vector.broadcast %cst_113 : f32 to vector<16x1xf32>
    %330 = arith.divf %328, %329 : vector<16x1xf32>
    %331 = vector.broadcast %323 : vector<16x1xf32> to vector<16x32xf32>
    %332 = arith.subf %315, %331 : vector<16x32xf32>
    %cst_114 = arith.constant 9.99999996E-13 : f32
    %333 = vector.broadcast %cst_114 : f32 to vector<16x1xf32>
    %334 = arith.addf %330, %333 : vector<16x1xf32>
    %335 = math.rsqrt %334 : vector<16x1xf32>
    %336 = vector.broadcast %335 : vector<16x1xf32> to vector<16x32xf32>
    %337 = arith.mulf %332, %336 : vector<16x32xf32>
    %338 = vector.broadcast %317 : vector<1x32xf32> to vector<16x32xf32>
    %339 = arith.mulf %337, %338 : vector<16x32xf32>
    %340 = vector.broadcast %318 : vector<1x32xf32> to vector<16x32xf32>
    %341 = arith.addf %339, %340 : vector<16x32xf32>
    %c0_115 = arith.constant 0 : index
    %c0_116 = arith.constant 0 : index
    %342 = vector.load %arg6[%c0_115, %c0_116] : memref<16x1xf32, #tpu.memory_space<vmem>>, vector<16x1xf32>
    %343 = vector.broadcast %342 : vector<16x1xf32> to vector<16x32xf32>
    %344 = arith.mulf %341, %343 : vector<16x32xf32>
    %345 = vector.extract_strided_slice %344 {offsets = [0, 0], sizes = [8, 32], strides = [1, 1]} : vector<16x32xf32> to vector<8x32xf32>
    %cst_117 = arith.constant dense<0.000000e+00> : vector<32xf32>
    %346 = vector.multi_reduction <add>, %345, %cst_117 [0] : vector<8x32xf32> to vector<32xf32>
    %347 = vector.shape_cast %346 : vector<32xf32> to vector<1x32xf32>
    %348 = vector.extract_strided_slice %344 {offsets = [8, 0], sizes = [8, 32], strides = [1, 1]} : vector<16x32xf32> to vector<8x32xf32>
    %cst_118 = arith.constant dense<0.000000e+00> : vector<32xf32>
    %349 = vector.multi_reduction <add>, %348, %cst_118 [0] : vector<8x32xf32> to vector<32xf32>
    %350 = vector.shape_cast %349 : vector<32xf32> to vector<1x32xf32>
    %351 = tpu.concatenate %347, %350 in 0 : vector<1x32xf32>, vector<1x32xf32> -> vector<2x32xf32>
    %c0_119 = arith.constant 0 : index
    %c0_120 = arith.constant 0 : index
    %352 = vector.load %arg13[%c0_119, %c0_120] : memref<32x128xbf16, #tpu.memory_space<vmem>>, vector<32x128xbf16>
    %353 = arith.truncf %351 : vector<2x32xf32> to vector<2x32xbf16>
    %cst_121 = arith.constant dense<0.000000e+00> : vector<2x128xf32>
    %354 = tpu.matmul %353, %352, %cst_121 {dimension_numbers = #tpu.dot_dimension_numbers<[1], [0], [0], [1], [0, 0, 1, 1], [], []>} : vector<2x32xbf16>, vector<32x128xbf16>, vector<2x128xf32> -> vector<2x128xf32>
    %355 = vector.broadcast %319 : vector<1x128xf32> to vector<2x128xf32>
    %356 = arith.addf %354, %355 : vector<2x128xf32>
    %cst_122 = arith.constant 0.000000e+00 : f32
    %357 = vector.broadcast %cst_122 : f32 to vector<2x128xf32>
    %358 = arith.maximumf %356, %357 : vector<2x128xf32>
    %cst_123 = arith.constant 0.000000e+00 : f32
    %359 = vector.broadcast %cst_123 : f32 to vector<2x96xf32>
    %360 = tpu.concatenate %351, %359 in 1 : vector<2x32xf32>, vector<2x96xf32> -> vector<2x128xf32>
    %361 = tpu.concatenate %358, %360 in 0 : vector<2x128xf32>, vector<2x128xf32> -> vector<4x128xf32>
    %c0_124 = arith.constant 0 : index
    %c0_125 = arith.constant 0 : index
    %362 = vector.load %arg14[%c0_124, %c0_125] : memref<4x128xf32, #tpu.memory_space<vmem>>, vector<4x128xf32>
    tpu.vector_store %arg14[%c0_124, %c0_125], %361 {strides = array<i32>} : memref<4x128xf32, #tpu.memory_space<vmem>>, vector<4x128xf32>,
    return
  }
  func.func @transform_0(%arg0: i32) -> (i32, i32) {
    %c0_i32 = arith.constant 0 : i32
    %c0_i32_0 = arith.constant 0 : i32
    %c0_i32_1 = arith.constant 0 : i32
    return %c0_i32, %c0_i32_0 : i32, i32
  }
  func.func @transform_1(%arg0: i32) -> (i32, i32) {
    %c0_i32 = arith.constant 0 : i32
    %c0_i32_0 = arith.constant 0 : i32
    %c0_i32_1 = arith.constant 0 : i32
    return %c0_i32, %c0_i32_0 : i32, i32
  }
  func.func @transform_2(%arg0: i32) -> (i32, i32) {
    %c0_i32 = arith.constant 0 : i32
    %c0_i32_0 = arith.constant 0 : i32
    %c0_i32_1 = arith.constant 0 : i32
    return %c0_i32, %c0_i32_0 : i32, i32
  }
  func.func @transform_3(%arg0: i32) -> (i32, i32) {
    %c0_i32 = arith.constant 0 : i32
    %c0_i32_0 = arith.constant 0 : i32
    %c0_i32_1 = arith.constant 0 : i32
    return %c0_i32, %c0_i32_0 : i32, i32
  }
  func.func @transform_4(%arg0: i32) -> (i32, i32) {
    %c0_i32 = arith.constant 0 : i32
    %c0_i32_0 = arith.constant 0 : i32
    %c0_i32_1 = arith.constant 0 : i32
    return %c0_i32, %c0_i32_0 : i32, i32
  }
  func.func @transform_5(%arg0: i32) -> (i32, i32) {
    %c0_i32 = arith.constant 0 : i32
    %c0_i32_0 = arith.constant 0 : i32
    %c0_i32_1 = arith.constant 0 : i32
    return %c0_i32, %c0_i32_0 : i32, i32
  }
  func.func @transform_6(%arg0: i32) -> (i32, i32, i32) {
    %c0_i32 = arith.constant 0 : i32
    %c0_i32_0 = arith.constant 0 : i32
    %c0_i32_1 = arith.constant 0 : i32
    %c0_i32_2 = arith.constant 0 : i32
    return %c0_i32, %c0_i32_0, %c0_i32_1 : i32, i32, i32
  }
  func.func @transform_7(%arg0: i32) -> (i32, i32, i32) {
    %c0_i32 = arith.constant 0 : i32
    %c0_i32_0 = arith.constant 0 : i32
    %c0_i32_1 = arith.constant 0 : i32
    %c0_i32_2 = arith.constant 0 : i32
    return %c0_i32, %c0_i32_0, %c0_i32_1 : i32, i32, i32
  }
  func.func @transform_8(%arg0: i32) -> (i32, i32, i32) {
    %c0_i32 = arith.constant 0 : i32
    %c0_i32_0 = arith.constant 0 : i32
    %c0_i32_1 = arith.constant 0 : i32
    %c0_i32_2 = arith.constant 0 : i32
    return %c0_i32, %c0_i32_0, %c0_i32_1 : i32, i32, i32
  }
  func.func @transform_9(%arg0: i32) -> (i32, i32, i32) {
    %c0_i32 = arith.constant 0 : i32
    %c0_i32_0 = arith.constant 0 : i32
    %c0_i32_1 = arith.constant 0 : i32
    %c0_i32_2 = arith.constant 0 : i32
    return %c0_i32, %c0_i32_0, %c0_i32_1 : i32, i32, i32
  }
  func.func @transform_10(%arg0: i32) -> (i32, i32, i32) {
    %c0_i32 = arith.constant 0 : i32
    %c0_i32_0 = arith.constant 0 : i32
    %c0_i32_1 = arith.constant 0 : i32
    %c0_i32_2 = arith.constant 0 : i32
    return %c0_i32, %c0_i32_0, %c0_i32_1 : i32, i32, i32
  }
  func.func @transform_11(%arg0: i32) -> (i32, i32) {
    %c0_i32 = arith.constant 0 : i32
    %c0_i32_0 = arith.constant 0 : i32
    %c0_i32_1 = arith.constant 0 : i32
    return %c0_i32, %c0_i32_0 : i32, i32
  }
  func.func @transform_12(%arg0: i32) -> (i32, i32) {
    %c0_i32 = arith.constant 0 : i32
    %c0_i32_0 = arith.constant 0 : i32
    %c0_i32_1 = arith.constant 0 : i32
    return %c0_i32, %c0_i32_0 : i32, i32
  }
  func.func @transform_13(%arg0: i32) -> (i32, i32) {
    %c0_i32 = arith.constant 0 : i32
    %c0_i32_0 = arith.constant 0 : i32
    %c0_i32_1 = arith.constant 0 : i32
    return %c0_i32, %c0_i32_0 : i32, i32
  }
}

</mosaic_0001>

<bundles_post_ra>
// kernel: vit_classifier_forward.1
= control target key start
LH: loop header
LB: loop body
LE: loop exit
PB: predicated region body
PF: predicated region fallthrough
CT: control target
= control target key end

     0   :  { %v2196_v0 = vmov 0   ;;  %vm149_vm0 = vcmask 523264   ;;  %vm211_vm1 = vcmask 261120   ;;  %v2197_v39 = vmov 0.0   ;;  %s2199_s26 = smov 96   ;;  %s2799_s1 = inlined_call_operand.vmem [shape: bf16[192,32], index: 1, kind: input, shape index: {}]   ;;  %s2800_s0 = inlined_call_operand.vmem [shape: f32[16,192], index: 0, kind: input, shape index: {}]   ;;  %s2801_s2 = inlined_call_operand.vmem [shape: f32[16,32], index: 2, kind: input, shape index: {}]   ;;  %s2802_s6 = inlined_call_operand.vmem [shape: bf16[2,32,96], index: 6, kind: input, shape index: {}]   ;;  %s2803_s10 = inlined_call_operand.vmem [shape: f32[2,8,128], index: 10, kind: input, shape index: {}]   ;;  %s2804_s3 = inlined_call_operand.vmem [shape: f32[64,32], index: 3, kind: input, shape index: {}]   ;;  %s2805_s4 = inlined_call_operand.vmem [shape: f32[64,16], index: 4, kind: input, shape index: {}]   ;;  %s2806_s7 = inlined_call_operand.vmem [shape: bf16[2,32,32], index: 7, kind: input, shape index: {}]   ;;  %s2807_s8 = inlined_call_operand.vmem [shape: bf16[2,32,64], index: 8, kind: input, shape index: {}]   ;;  %s2808_s9 = inlined_call_operand.vmem [shape: bf16[2,64,32], index: 9, kind: input, shape index: {}]   ;;  %s2809_s5 = inlined_call_operand.vmem [shape: f32[16,1], index: 5, kind: input, shape index: {}]   ;;  %s2810_s12 = inlined_call_operand.vmem [shape: bf16[32,128], index: 12, kind: input, shape index: {}]   ;;  %s2811_s11 = inlined_call_operand.vmem [shape: f32[8,128], index: 11, kind: input, shape index: {}]   ;;  %s2812_s13 = inlined_call_operand.vmem [shape: f32[4,128], index: 13, kind: output, shape index: {}]  }
   0x1   :  { %153 = vmatprep.subr.bf16.mxu0 %v2196_v0  ;;  %v2054_v1 = vld [vmem:[%s2799_s1 + $0x38] sm:$0xff]   ;;  %2052 = vset.pattern.permute.xlu0 %v2196_v0  ;;  %v2055_v2 = vld [vmem:[%s2799_s1 + $0x30] sm:$0xff]   ;;  %v2056_v3 = vld [vmem:[%s2799_s1 + $0x28] sm:$0xff]   ;;  %vm2198_vm2 = vmmov 0   ;;  %v239_v48 = vlaneseq  ;;  %vm428_vm3 = vcmask 130048   ;;  %vm1715_vm8 = vcmask 1040384  }
   0x2   :  { %2053 = vset.pattern.permute.xlu1 %v2196_v0  ;;  %154 = vmatpush1.bf16.msra.mxu0 %v2054_v1  ;;  %v2057_v4 = vld [vmem:[%s2799_s1 + $0x20] sm:$0xff]   ;;  %v46_v5 = vld [vmem:[%s2800_s0 + $0x8] sm:$0xff]  ;;  %v48_v6 = vld [vmem:[%s2800_s0 + $0x18] sm:$0xff]  ;;  %vm1786_vm9 = vcmask 1041408  }
   0x3   :  { %155 = vmatprep.subr.bf16.mxu0 %v2196_v0  ;;  %v74_v7 = vpack.c.bf16 %v48_v6, %v46_v5  ;;  %v2058_v8 = vld [vmem:[%s2799_s1 + $0x18] sm:$0xff]   ;;  %v2059_v9 = vld [vmem:[%s2799_s1 + $0x10] sm:$0xff]   ;;  %v2060_v10 = vld [vmem:[%s2799_s1 + $0x8] sm:$0xff]   ;;  %1925 = vmatprep.subr.bf16.mxu1 %v2197_v39  ;;  %v2351_v49 = vshrl.u32 %v239_v48, 7 }
   0x4   :  { %v2061_v11 = vld [vmem:[%s2799_s1] sm:$0xff]   ;;  %v2062_v12 = vld [vmem:[%s2799_s1 + $0x58] sm:$0xff]   ;;  %v2063_v13 = vld [vmem:[%s2799_s1 + $0x50] sm:$0xff]   ;;  %1929 = vmatprep.mubr.msk.bf16.mxu1 %vm2198_vm2, %v2197_v39 }
   0x5   :  { %1805 = vmatprep.mubr.msk.bf16.mxu0 %vm149_vm0, %v74_v7  ;;  %v2064_v14 = vld [vmem:[%s2799_s1 + $0x48] sm:$0xff]   ;;  %v2065_v15 = vld [vmem:[%s2799_s1 + $0x40] sm:$0xff]   ;;  %v47_v17 = vld [vmem:[%s2800_s0 + $0x10] sm:$0xff]  ;;  %v2354_v50 = vsub.s32 0, %v2351_v49  ;;  %v2364_v55 = vsub.s32 1, %v2351_v49 }
   0x6   :  { %156 = vmatpush1.bf16.msra.mxu0 %v2055_v2  ;;  %v45_v16 = vld [vmem:[%s2800_s0] sm:$0xff]  ;;  %v76_v23 = vld [vmem:[%s2801_s2 + $0x8] sm:$0xff]  ;;  %v2377_v5 = vld [vmem:[%s2804_s3 + $0x10] sm:$0xff] }
   0x7   :  { %157 = vmatprep.subr.bf16.mxu0 %v2196_v0  ;;  %v73_v18 = vpack.c.bf16 %v47_v17, %v45_v16  ;;  %v75_v19 = vld [vmem:[%s2801_s2] sm:$0xff]  ;;  %v2066_v40 = vld [vmem:[%s2802_s6 + $0x8] sm:$0xff]   ;;  %v2453_v48 = vld [vmem:[%s2805_s4 + $0x30] sm:$0xff] }
   0x8   :  { %1926 = vmatpush3.bf16.msra.mxu1 %v2066_v40  ;;  %v2067_v41 = vld [vmem:[%s2802_s6] sm:$0xff]  }
   0x9   :  { %1927 = vmatprep.subr.bf16.mxu1 %v2197_v39  ;;  %v2359_v51 = vld [vmem:[%s2803_s10] sm:$0xff] }
   0xa   :  { %158 = vmatpush1.bf16.msra.mxu0 %v2056_v3  ;;  %v242_v54 = vrot.slane %v2359_v51, %v2354_v50  ;;  %v248_v59 = vrot.slane %v2359_v51, %v2364_v55  ;;  %v2382_v6 = vld [vmem:[%s2804_s3] sm:$0xff] }
   0xb   :  { %159 = vmatprep.subr.bf16.mxu0 %v2196_v0  ;;  %v2387_v7 = vld [vmem:[%s2804_s3 + $0x20] sm:$0xff] }
   0xc   :  { %1928 = vmatpush3.bf16.msra.mxu1 %v2067_v41 }
   0xe   :  { %160 = vmatpush1.bf16.msra.mxu0 %v2057_v4 }
   0xf   :  { %161 = vmatprep.subr.bf16.mxu0 %v2196_v0 }
  0x12   :  { %162 = vmatpush1.bf16.msra.mxu0 %v2058_v8  ;;  %v2392_v8 = vld [vmem:[%s2804_s3 + $0x18] sm:$0xff] }
  0x13   :  { %163 = vmatprep.subr.bf16.mxu0 %v2196_v0 }
  0x16   :  { %164 = vmatpush1.bf16.msra.mxu0 %v2059_v9 }
  0x17   :  { %165 = vmatprep.subr.bf16.mxu0 %v2196_v0 }
  0x1a   :  { %166 = vmatpush1.bf16.msra.mxu0 %v2060_v10  ;;  %v2397_v10 = vld [vmem:[%s2804_s3 + $0x8] sm:$0xff] }
  0x1b   :  { %167 = vmatprep.subr.bf16.mxu0 %v2196_v0 }
  0x1e   :  { %168 = vmatpush1.bf16.msra.mxu0 %v2061_v11  ;;  %v2402_v11 = vld [vmem:[%s2804_s3 + $0x28] sm:$0xff] }
  0x1f   :  { %177 = vmatprep.subr.bf16.mxu0 %v2196_v0 }
  0x22   :  { %178 = vmatpush2.bf16.msra.mxu0 %v2062_v12 }
  0x23   :  { %179 = vmatprep.subr.bf16.mxu0 %v2196_v0 }
  0x26   :  { %180 = vmatpush2.bf16.msra.mxu0 %v2063_v13  ;;  %v2407_v13 = vld [vmem:[%s2804_s3 + $0x30] sm:$0xff] }
  0x27   :  { %181 = vmatprep.subr.bf16.mxu0 %v2196_v0 }
  0x2a   :  { %182 = vmatpush2.bf16.msra.mxu0 %v2064_v14  ;;  %v2412_v14 = vld [vmem:[%s2804_s3 + $0x38] sm:$0xff] }
  0x2b   :  { %183 = vmatprep.subr.bf16.mxu0 %v2196_v0  ;;  %v2370_v0 = vsub.s32 2, %v2351_v49 }
  0x2d   :  { %v259_v1 = vrot.slane %v2359_v51, %v2370_v0 }
  0x2e   :  { %184 = vmatpush2.bf16.msra.mxu0 %v2065_v15 }
  0x2f   :  { %1961 = vmatprep.subr.bf16.mxu0 %v2197_v39 }
  0x31   :  { %186 = vmatmul.mubr.bf16.vlgmr.msra.gmra.mxu0 %v73_v18 }
  0x32   :  { %1965 = vmatprep.mubr.msk.bf16.mxu0 %vm2198_vm2, %v2197_v39 }
  0xf1   :  { %v187_v20 = vpop.f32.mrf.mxu0 }
  0xf2   :  { %v2323_v21 = vadd.f32 %v187_v20, %v75_v19 }
  0xf3   :  { %v189_v22 = vpop.f32.mrf.mxu0 }
  0xf4   :  { %v212_v24 = vsel %vm211_vm1, %v2323_v21, 0.0 }
  0xf5   :  { %v190_v25 = vpop.f32.mrf.mxu0  ;;  %213 = vadd.xlane.f32.xlu0 %v212_v24 }
  0xf6   :  { %v2330_v26 = vadd.f32 %v190_v25, %v76_v23 }
  0xf7   :  { %v192_v27 = vpop.f32.mrf.mxu0 }
  0xf8   :  { %v215_v28 = vsel %vm211_vm1, %v2330_v26, 0.0 }
  0xf9   :  { %216 = vadd.xlane.f32.xlu0 %v215_v28 }
 0x17e   :  { %v214_v29 = vpop.xlane.xlu0 %213 }
 0x17f   :  { %v219_v30 = vmul.f32 0.03125, %v214_v29 }
 0x181   :  { %v221_v31 = vsub.f32 %v2323_v21, %v219_v30 }
 0x182   :  { %v217_v32 = vpop.xlane.xlu0 %216 }
 0x183   :  { %v220_v33 = vmul.f32 0.03125, %v217_v32  ;;  %v223_v34 = vmul.f32 %v221_v31, %v221_v31 }
 0x185   :  { %v222_v35 = vsub.f32 %v2330_v26, %v220_v33  ;;  %v225_v36 = vsel %vm211_vm1, %v223_v34, 0.0  ;;  %v2435_v34 = vld [vmem:[%s2805_s4 + $0x10] sm:$0xff] }
 0x186   :  { %226 = vadd.xlane.f32.xlu1 %v225_v36 }
 0x187   :  { %v224_v37 = vmul.f32 %v222_v35, %v222_v35 }
 0x189   :  { %v228_v38 = vsel %vm211_vm1, %v224_v37, 0.0  ;;  %v2440_v37 = vld [vmem:[%s2805_s4] sm:$0xff] }
 0x18a   :  { %229 = vadd.xlane.f32.xlu1 %v228_v38 }
 0x20f   :  { %v227_v42 = vpop.xlane.xlu1 %226 }
 0x210   :  { %v231_v43 = vmul.f32 0.03125, %v227_v42 }
 0x212   :  { %v233_v44 = vadd.f32 1e-12, %v231_v43 }
 0x213   :  { %v230_v45 = vpop.xlane.xlu1 %229 }
 0x214   :  { %2088 = vrsqrt.f32 %v233_v44  ;;  %v232_v46 = vmul.f32 0.03125, %v230_v45 }
 0x216   :  { %v234_v47 = vadd.f32 1e-12, %v232_v46  ;;  %v2448_v46 = vld [vmem:[%s2805_s4 + $0x18] sm:$0xff] }
 0x218   :  { %2090 = vrsqrt.f32 %v234_v47 }
 0x221   :  { %v2089_v52 = vpop.eup %2088 }
 0x222   :  { %v237_v53 = vmul.f32 %v2089_v52, %v221_v31 }
 0x224   :  { %v243_v58 = vmul.f32 %v242_v54, %v237_v53 }
 0x225   :  { %v2091_v56 = vpop.eup %2090 }
 0x226   :  { %v238_v57 = vmul.f32 %v2091_v56, %v222_v35  ;;  %v249_v61 = vadd.f32 %v248_v59, %v243_v58  ;;  %v2460_v58 = vld [vmem:[%s2805_s4 + $0x8] sm:$0xff] }
 0x228   :  { %v244_v60 = vmul.f32 %v242_v54, %v238_v57 }
 0x22a   :  { %v250_v62 = vadd.f32 %v248_v59, %v244_v60 }
 0x22c   :  { %v255_v63 = vpack.c.bf16 %v250_v62, %v249_v61 }
 0x22e   :  { %1930 = vmatmul.mubr.msk.bf16.vlgmr.msra.gmra.mxu1 %vm211_vm1, %v255_v63 }
 0x2ee   :  { %v309_v2 = vpop.f32.mrf.mxu1 }
 0x2ef   :  { %v310_v3 = vadd.f32 %v309_v2, %v259_v1 }
 0x2f0   :  { %v1931_v4 = vpop.f32.mrf.mxu1 }
 0x2f1   :  { %v318_v15 = vmul.f32 %v310_v3, %v2377_v5  ;;  %v316_v17 = vmul.f32 %v310_v3, %v2382_v6  ;;  %v320_v18 = vmul.f32 %v310_v3, %v2387_v7  ;;  %v322_v24 = vmul.f32 %v310_v3, %v2407_v13 }
 0x2f2   :  { %v312_v9 = vpop.f32.mrf.mxu1 }
 0x2f3   :  { %v313_v12 = vadd.f32 %v312_v9, %v259_v1 }
 0x2f4   :  { %v1932_v16 = vpop.f32.mrf.mxu1 }
 0x2f5   :  { %v319_v19 = vmul.f32 %v313_v12, %v2392_v8  ;;  %v2418_v20 = vpack.c.bf16 %v313_v12, %v310_v3  ;;  %v317_v22 = vmul.f32 %v313_v12, %v2397_v10  ;;  %v321_v23 = vmul.f32 %v313_v12, %v2402_v11  ;;  %v2469_v3 = vld [vmem:[%s2805_s4 + $0x20] sm:$0xff] }
 0x2f6   :  { %v323_v25 = vmul.f32 %v313_v12, %v2412_v14 }
 0x2f7   :  { %330 = vrot.lane.b32.xlu0 %v2418_v20, %s2199_s26  ;;  %v324_v27 = vpack.c.bf16 %v317_v22, %v316_v17  ;;  %v325_v28 = vpack.c.bf16 %v319_v19, %v318_v15  ;;  %v326_v29 = vpack.c.bf16 %v321_v23, %v320_v18  ;;  %v2476_v15 = vld [vmem:[%s2805_s4 + $0x28] sm:$0xff]  ;;  %v2483_v19 = vld [vmem:[%s2805_s4 + $0x38] sm:$0xff]  ;;  %s2200_s4 = smov 64  }
 0x2f8   :  { %v327_v30 = vpack.c.bf16 %v323_v25, %v322_v24 }
 0x2f9   :  { %1935 = vmatprep.mubr.msk.bf16.mxu1 %vm211_vm1, %v324_v27 }
 0x369   :  { %v331_v31 = vpop.permute.xlu0 %330 }
 0x36a   :  { %v345_v32 = vsel %vm211_vm1, %v331_v31, 0  ;;  %2045 = vmatprep.subr.msk.bf16.mxu1 %vm211_vm1, %v331_v31 }
 0x36b   :  { %1934 = vmatpush3.bf16.xpose.msra.mxu1 %v345_v32 }
 0x372   :  { %1936 = vmatmul.mubr.msk.bf16.vlgmr.msra.gmra.mxu1 %vm211_vm1, %v325_v28 }
 0x373   :  { %1939 = vmatprep.mubr.msk.bf16.mxu1 %vm211_vm1, %v326_v29 }
 0x37a   :  { %1940 = vmatmul.mubr.msk.bf16.gmra.mxu1 %vm211_vm1, %v327_v30 }
 0x432   :  { %v1937_v33 = vpop.f32.mrf.mxu1 }
 0x433   :  { %v414_v35 = vmul.f32 0.35355338, %v1937_v33 }
 0x434   :  { %v381_v36 = vpop.f32.mrf.mxu1 }
 0x435   :  { %v412_v38 = vmul.f32 0.35355338, %v381_v36  ;;  %v422_v40 = vadd.f32 %v414_v35, %v2435_v34 }
 0x436   :  { %v1938_v41 = vpop.f32.mrf.mxu1 }
 0x437   :  { %v415_v42 = vmul.f32 0.35355338, %v1938_v41  ;;  %v435_v43 = vsel %vm428_vm3, %v422_v40, -inf  ;;  %v420_v44 = vadd.f32 %v412_v38, %v2440_v37 }
 0x438   :  { %436 = vmax.xlane.f32.xlu1 %v435_v43  ;;  %v384_v45 = vpop.f32.mrf.mxu1 }
 0x439   :  { %v413_v52 = vmul.f32 0.35355338, %v384_v45  ;;  %v429_v54 = vsel %vm428_vm3, %v420_v44, -inf  ;;  %v423_v56 = vadd.f32 %v415_v42, %v2448_v46 }
 0x43a   :  { %v1941_v47 = vpop.f32.mrf.mxu1 }
 0x43b   :  { %v418_v53 = vmul.f32 0.35355338, %v1941_v47  ;;  %v438_v62 = vsel %vm428_vm3, %v423_v56, -inf  ;;  %v421_v1 = vadd.f32 %v413_v52, %v2460_v58 }
 0x43c   :  { %430 = vmax.xlane.f32.xlu1 %v429_v54  ;;  %v397_v57 = vpop.f32.mrf.mxu1 }
 0x43d   :  { %v426_v59 = vadd.f32 %v418_v53, %v2453_v48  ;;  %v416_v61 = vmul.f32 0.35355338, %v397_v57  ;;  %v432_v9 = vsel %vm428_vm3, %v421_v1, -inf }
 0x43e   :  { %v1942_v60 = vpop.f32.mrf.mxu1 }
 0x43f   :  { %v447_v63 = vsel %vm428_vm3, %v426_v59, -inf  ;;  %v424_v12 = vadd.f32 %v416_v61, %v2469_v3  ;;  %v419_v16 = vmul.f32 0.35355338, %v1942_v60 }
 0x440   :  { %439 = vmax.xlane.f32.xlu1 %v438_v62  ;;  %448 = vmax.xlane.f32.xlu0 %v447_v63  ;;  %v400_v2 = vpop.f32.mrf.mxu1 }
 0x441   :  { %v417_v4 = vmul.f32 0.35355338, %v400_v2  ;;  %v441_v17 = vsel %vm428_vm3, %v424_v12, -inf  ;;  %v427_v23 = vadd.f32 %v419_v16, %v2483_v19 }
 0x443   :  { %v425_v18 = vadd.f32 %v417_v4, %v2476_v15  ;;  %v450_v24 = vsel %vm428_vm3, %v427_v23, -inf }
 0x444   :  { %433 = vmax.xlane.f32.xlu1 %v432_v9 }
 0x445   :  { %v444_v22 = vsel %vm428_vm3, %v425_v18, -inf }
 0x448   :  { %442 = vmax.xlane.f32.xlu1 %v441_v17 }
 0x44c   :  { %445 = vmax.xlane.f32.xlu1 %v444_v22 }
 0x450   :  { %451 = vmax.xlane.f32.xlu1 %v450_v24 }
 0x4c1   :  { %v437_v25 = vpop.xlane.xlu1 %436 }
 0x4c2   :  { %v455_v27 = vsub.f32 %v422_v40, %v437_v25 }
 0x4c4   :  { %v465_v28 = vmul.f32 1.442695, %v455_v27 }
 0x4c5   :  { %v431_v29 = vpop.xlane.xlu1 %430 }
 0x4c6   :  { %2092 = vpow2.f32 %v465_v28  ;;  %v453_v30 = vsub.f32 %v420_v44, %v431_v29 }
 0x4c8   :  { %v461_v31 = vmul.f32 1.442695, %v453_v30 }
 0x4c9   :  { %v440_v32 = vpop.xlane.xlu1 %439  ;;  %v449_v33 = vpop.xlane.xlu0 %448 }
 0x4ca   :  { %2094 = vpow2.f32 %v461_v31  ;;  %v456_v35 = vsub.f32 %v423_v56, %v440_v32  ;;  %v459_v38 = vsub.f32 %v426_v59, %v449_v33 }
 0x4cc   :  { %v467_v36 = vmul.f32 1.442695, %v456_v35  ;;  %v473_v43 = vmul.f32 1.442695, %v459_v38 }
 0x4cd   :  { %v434_v41 = vpop.xlane.xlu1 %433 }
 0x4ce   :  { %2096 = vpow2.f32 %v467_v36  ;;  %v454_v42 = vsub.f32 %v421_v1, %v434_v41 }
 0x4d0   :  { %v463_v45 = vmul.f32 1.442695, %v454_v42 }
 0x4d1   :  { %v443_v47 = vpop.xlane.xlu1 %442 }
 0x4d2   :  { %2098 = vpow2.f32 %v463_v45  ;;  %v457_v52 = vsub.f32 %v424_v12, %v443_v47 }
 0x4d3   :  { %v2093_v40 = vpop.eup %2092  ;;  %2100 = vpow2.f32 %v473_v43 }
 0x4d4   :  { %v469_v53 = vmul.f32 1.442695, %v457_v52  ;;  %v483_v44 = vsel %vm428_vm3, %v2093_v40, 0.0 }
 0x4d5   :  { %484 = vadd.xlane.f32.xlu1 %v483_v44  ;;  %v446_v54 = vpop.xlane.xlu1 %445 }
 0x4d6   :  { %v458_v57 = vsub.f32 %v425_v18, %v446_v54  ;;  %2102 = vpow2.f32 %v469_v53 }
 0x4d7   :  { %v2095_v60 = vpop.eup %2094 }
 0x4d8   :  { %v471_v56 = vmul.f32 1.442695, %v458_v57  ;;  %v477_v59 = vsel %vm428_vm3, %v2095_v60, 0.0 }
 0x4d9   :  { %478 = vadd.xlane.f32.xlu1 %v477_v59  ;;  %v452_v61 = vpop.xlane.xlu1 %451 }
 0x4da   :  { %v460_v62 = vsub.f32 %v427_v23, %v452_v61  ;;  %2104 = vpow2.f32 %v471_v56 }
 0x4db   :  { %v2097_v63 = vpop.eup %2096 }
 0x4dc   :  { %v475_v1 = vmul.f32 1.442695, %v460_v62  ;;  %v486_v2 = vsel %vm428_vm3, %v2097_v63, 0.0 }
 0x4dd   :  { %487 = vadd.xlane.f32.xlu1 %v486_v2  ;;  %v2068_v2 = vld [vmem:[%s2806_s7 + $0x8] sm:$0xff]  }
 0x4de   :  { %2106 = vpow2.f32 %v475_v1 }
 0x4df   :  { %v2099_v4 = vpop.eup %2098 }
 0x4e0   :  { %v480_v9 = vsel %vm428_vm3, %v2099_v4, 0.0  ;;  %v2101_v12 = vpop.eup %2100 }
 0x4e1   :  { %481 = vadd.xlane.f32.xlu1 %v480_v9  ;;  %v495_v16 = vsel %vm428_vm3, %v2101_v12, 0.0 }
 0x4e3   :  { %v2103_v17 = vpop.eup %2102 }
 0x4e4   :  { %v489_v18 = vsel %vm428_vm3, %v2103_v17, 0.0 }
 0x4e5   :  { %496 = vadd.xlane.f32.xlu1 %v495_v16 }
 0x4e7   :  { %v2105_v22 = vpop.eup %2104 }
 0x4e8   :  { %v492_v24 = vsel %vm428_vm3, %v2105_v22, 0.0 }
 0x4e9   :  { %490 = vadd.xlane.f32.xlu1 %v489_v18 }
 0x4eb   :  { %v2107_v23 = vpop.eup %2106 }
 0x4ec   :  { %v498_v25 = vsel %vm428_vm3, %v2107_v23, 0.0 }
 0x4ed   :  { %493 = vadd.xlane.f32.xlu1 %v492_v24  ;;  %499 = vadd.xlane.f32.xlu0 %v498_v25 }
 0x4fe   :  { %521 = vrot.lane.b32.xlu1 %v2418_v20, %s2200_s4 }
 0x55e   :  { %v485_v27 = vpop.xlane.xlu1 %484 }
 0x562   :  { %v479_v28 = vpop.xlane.xlu1 %478 }
 0x563   :  { %2108 = vrcp.f32 %v479_v28 }
 0x566   :  { %v488_v29 = vpop.xlane.xlu1 %487 }
 0x567   :  { %2110 = vrcp.f32 %v488_v29 }
 0x568   :  { %2112 = vrcp.f32 %v485_v27 }
 0x56a   :  { %v482_v30 = vpop.xlane.xlu1 %481 }
 0x56b   :  { %2114 = vrcp.f32 %v482_v30 }
 0x56e   :  { %v497_v31 = vpop.xlane.xlu1 %496 }
 0x56f   :  { %2116 = vrcp.f32 %v497_v31 }
 0x570   :  { %v2109_v33 = vpop.eup %2108 }
 0x571   :  { %v509_v43 = vmul.f32 %v2109_v33, %v2095_v60 }
 0x572   :  { %v491_v32 = vpop.xlane.xlu1 %490 }
 0x573   :  { %2118 = vrcp.f32 %v491_v32 }
 0x574   :  { %v2111_v35 = vpop.eup %2110 }
 0x575   :  { %v2113_v41 = vpop.eup %2112  ;;  %v512_v20 = vmul.f32 %v2111_v35, %v2097_v63 }
 0x576   :  { %v500_v36 = vpop.xlane.xlu0 %499  ;;  %v494_v38 = vpop.xlane.xlu1 %493  ;;  %v511_v52 = vmul.f32 %v2113_v41, %v2093_v40 }
 0x577   :  { %2120 = vrcp.f32 %v500_v36 }
 0x578   :  { %v2115_v42 = vpop.eup %2114  ;;  %2122 = vrcp.f32 %v494_v38  ;;  %v518_v44 = vpack.c.bf16 %v512_v20, %v511_v52 }
 0x579   :  { %v510_v45 = vmul.f32 %v2115_v42, %v2099_v4  ;;  %v2069_v4 = vld [vmem:[%s2806_s7] sm:$0xff]  }
 0x57a   :  { %v522_v47 = vpop.permute.xlu1 %521 }
 0x57b   :  { %1943 = vmatprep.subr.bf16.mxu1 %v522_v47  ;;  %v517_v53 = vpack.c.bf16 %v510_v45, %v509_v43  ;;  %v680_v45 = vsub.s32 3, %v2351_v49 }
 0x57c   :  { %1944 = vmatpush3.bf16.msra.mxu1 %v522_v47  ;;  %v2117_v54 = vpop.eup %2116 }
 0x57d   :  { %1945 = vmatprep.mubr.msk.bf16.mxu1 %vm428_vm3, %v517_v53  ;;  %1953 = vmatprep.subr.bf16.mxu1 %v2197_v39  ;;  %v515_v61 = vmul.f32 %v2117_v54, %v2101_v12  ;;  %v681_v47 = vrot.slane %v2359_v51, %v680_v45 }
 0x57f   :  { %1946 = vmatmul.mubr.msk.bf16.vlgmr.msra.gmra.mxu1 %vm428_vm3, %v518_v44 }
 0x580   :  { %v2119_v57 = vpop.eup %2118  ;;  %1954 = vmatpush3.bf16.msra.mxu1 %v2068_v2 }
 0x581   :  { %v513_v60 = vmul.f32 %v2119_v57, %v2103_v17  ;;  %1955 = vmatprep.subr.bf16.mxu1 %v2197_v39 }
 0x584   :  { %v2121_v56 = vpop.eup %2120  ;;  %1956 = vmatpush3.bf16.msra.mxu1 %v2069_v4 }
 0x585   :  { %v2123_v59 = vpop.eup %2122  ;;  %v516_v62 = vmul.f32 %v2121_v56, %v2107_v23  ;;  %1969 = vmatprep.subr.bf16.mxu1 %v2197_v39 }
 0x586   :  { %v514_v63 = vmul.f32 %v2123_v59, %v2105_v22 }
 0x587   :  { %v520_v1 = vpack.c.bf16 %v516_v62, %v515_v61 }
 0x588   :  { %v519_v40 = vpack.c.bf16 %v514_v63, %v513_v60 }
 0x58a   :  { %1949 = vmatprep.mubr.msk.bf16.mxu1 %vm428_vm3, %v519_v40 }
 0x58b   :  { %1950 = vmatmul.mubr.msk.bf16.gmra.mxu1 %vm428_vm3, %v520_v1 }
 0x58c   :  { %1957 = vmatprep.mubr.msk.bf16.mxu1 %vm2198_vm2, %v2197_v39 }
 0x63f   :  { %v1947_v9 = vpop.f32.mrf.mxu1 }
 0x640   :  { %v603_v24 = vmul.f32 %v1947_v9, %v2377_v5 }
 0x641   :  { %v570_v12 = vpop.f32.mrf.mxu1 }
 0x642   :  { %v601_v22 = vmul.f32 %v570_v12, %v2382_v6 }
 0x643   :  { %v1948_v16 = vpop.f32.mrf.mxu1 }
 0x644   :  { %v609_v29 = vadd.f32 %v603_v24, %v601_v22  ;;  %v604_v30 = vmul.f32 %v1948_v16, %v2392_v8 }
 0x645   :  { %v573_v17 = vpop.f32.mrf.mxu1 }
 0x646   :  { %v602_v25 = vmul.f32 %v573_v17, %v2397_v10  ;;  %v2070_v17 = vld [vmem:[%s2807_s8 + $0x8] sm:$0xff]  }
 0x647   :  { %1962 = vmatpush3.bf16.msra.mxu0 %v2070_v17 }
 0x648   :  { %v610_v32 = vadd.f32 %v604_v30, %v602_v25  ;;  %1963 = vmatprep.subr.bf16.mxu0 %v2197_v39 }
 0x64b   :  { %v1951_v18 = vpop.f32.mrf.mxu1 }
 0x64c   :  { %v607_v36 = vmul.f32 %v1951_v18, %v2407_v13  ;;  %v2071_v18 = vld [vmem:[%s2807_s8] sm:$0xff]  }
 0x64d   :  { %v586_v23 = vpop.f32.mrf.mxu1  ;;  %1964 = vmatpush3.bf16.msra.mxu0 %v2071_v18 }
 0x64e   :  { %v605_v27 = vmul.f32 %v586_v23, %v2387_v7  ;;  %1981 = vmatprep.subr.bf16.mxu0 %v2197_v39 }
 0x64f   :  { %v1952_v28 = vpop.f32.mrf.mxu1 }
 0x650   :  { %v611_v33 = vadd.f32 %v609_v29, %v605_v27  ;;  %v608_v38 = vmul.f32 %v1952_v28, %v2412_v14  ;;  %v712_v29 = vsub.s32 4, %v2351_v49 }
 0x651   :  { %v589_v31 = vpop.f32.mrf.mxu1 }
 0x652   :  { %v606_v35 = vmul.f32 %v589_v31, %v2402_v11  ;;  %v613_v42 = vadd.f32 %v611_v33, %v607_v36  ;;  %v718_v33 = vsub.s32 5, %v2351_v49 }
 0x654   :  { %v612_v41 = vadd.f32 %v610_v32, %v606_v35  ;;  %v713_v32 = vrot.slane %v2359_v51, %v712_v29 }
 0x656   :  { %v614_v20 = vadd.f32 %v612_v41, %v608_v38  ;;  %v719_v41 = vrot.slane %v2359_v51, %v718_v33 }
 0x658   :  { %v619_v43 = vpack.c.bf16 %v614_v20, %v613_v42 }
 0x65a   :  { %1958 = vmatmul.mubr.msk.bf16.vlgmr.msra.gmra.mxu1 %vm211_vm1, %v619_v43 }
 0x65b   :  { %1977 = vmatprep.mubr.msk.bf16.mxu1 %vm2198_vm2, %v2197_v39 }
 0x71a   :  { %v669_v52 = vpop.f32.mrf.mxu1 }
 0x71b   :  { %v676_v53 = vadd.f32 %v669_v52, %v2323_v21  ;;  %v2072_v52 = vld [vmem:[%s2808_s9 + $0x18] sm:$0xff]  }
 0x71c   :  { %v1959_v44 = vpop.f32.mrf.mxu1  ;;  %1970 = vmatpush3.bf16.msra.mxu1 %v2072_v52 }
 0x71d   :  { %v2529_v54 = vadd.f32 %v681_v47, %v676_v53  ;;  %1971 = vmatprep.subr.bf16.mxu1 %v2197_v39  ;;  %v2073_v53 = vld [vmem:[%s2808_s9 + $0x10] sm:$0xff]   ;;  %v2074_v44 = vld [vmem:[%s2808_s9 + $0x8] sm:$0xff]  }
 0x71e   :  { %v672_v57 = vpop.f32.mrf.mxu1 }
 0x71f   :  { %v677_v56 = vadd.f32 %v672_v57, %v2330_v26  ;;  %v684_v59 = vsel %vm211_vm1, %v2529_v54, 0.0  ;;  %v2075_v57 = vld [vmem:[%s2808_s9] sm:$0xff]  }
 0x720   :  { %685 = vadd.xlane.f32.xlu0 %v684_v59  ;;  %v1960_v61 = vpop.f32.mrf.mxu1  ;;  %1972 = vmatpush3.bf16.msra.mxu1 %v2073_v53 }
 0x721   :  { %v2534_v62 = vadd.f32 %v681_v47, %v677_v56  ;;  %1973 = vmatprep.subr.bf16.mxu1 %v2197_v39  ;;  %v729_v56 = vsub.s32 6, %v2351_v49 }
 0x723   :  { %v687_v60 = vsel %vm211_vm1, %v2534_v62, 0.0  ;;  %v730_v59 = vrot.slane %v2359_v51, %v729_v56 }
 0x724   :  { %688 = vadd.xlane.f32.xlu0 %v687_v60  ;;  %1974 = vmatpush3.bf16.msra.mxu1 %v2074_v44 }
 0x725   :  { %1975 = vmatprep.subr.bf16.mxu1 %v2197_v39 }
 0x728   :  { %1976 = vmatpush3.bf16.msra.mxu1 %v2075_v57 }
 0x7a9   :  { %v686_v63 = vpop.xlane.xlu0 %685 }
 0x7aa   :  { %v690_v1 = vmul.f32 0.03125, %v686_v63 }
 0x7ac   :  { %v692_v21 = vsub.f32 %v2529_v54, %v690_v1 }
 0x7ad   :  { %v689_v40 = vpop.xlane.xlu0 %688 }
 0x7ae   :  { %v691_v2 = vmul.f32 0.03125, %v689_v40  ;;  %v694_v4 = vmul.f32 %v692_v21, %v692_v21 }
 0x7b0   :  { %v693_v26 = vsub.f32 %v2534_v62, %v691_v2  ;;  %v696_v9 = vsel %vm211_vm1, %v694_v4, 0.0 }
 0x7b1   :  { %697 = vadd.xlane.f32.xlu0 %v696_v9 }
 0x7b2   :  { %v695_v12 = vmul.f32 %v693_v26, %v693_v26 }
 0x7b4   :  { %v699_v16 = vsel %vm211_vm1, %v695_v12, 0.0 }
 0x7b5   :  { %700 = vadd.xlane.f32.xlu0 %v699_v16 }
 0x83a   :  { %v698_v22 = vpop.xlane.xlu0 %697 }
 0x83b   :  { %v702_v23 = vmul.f32 0.03125, %v698_v22 }
 0x83d   :  { %v704_v24 = vadd.f32 1e-12, %v702_v23 }
 0x83e   :  { %v701_v25 = vpop.xlane.xlu0 %700 }
 0x83f   :  { %2124 = vrsqrt.f32 %v704_v24  ;;  %v703_v27 = vmul.f32 0.03125, %v701_v25 }
 0x841   :  { %v705_v28 = vadd.f32 1e-12, %v703_v27 }
 0x843   :  { %2126 = vrsqrt.f32 %v705_v28 }
 0x84c   :  { %v2125_v30 = vpop.eup %2124 }
 0x84d   :  { %v708_v31 = vmul.f32 %v2125_v30, %v692_v21 }
 0x84f   :  { %v714_v38 = vmul.f32 %v713_v32, %v708_v31 }
 0x850   :  { %v2127_v35 = vpop.eup %2126 }
 0x851   :  { %v709_v36 = vmul.f32 %v2127_v35, %v693_v26  ;;  %v720_v20 = vadd.f32 %v719_v41, %v714_v38 }
 0x853   :  { %v715_v42 = vmul.f32 %v713_v32, %v709_v36 }
 0x855   :  { %v721_v43 = vadd.f32 %v719_v41, %v715_v42 }
 0x857   :  { %v726_v47 = vpack.c.bf16 %v721_v43, %v720_v20 }
 0x859   :  { %1966 = vmatmul.mubr.msk.bf16.vlgmr.msra.gmra.mxu0 %vm211_vm1, %v726_v47 }
 0x85a   :  { %1985 = vmatprep.mubr.msk.bf16.mxu0 %vm2198_vm2, %v2197_v39 }
 0x919   :  { %v780_v61 = vpop.f32.mrf.mxu0 }
 0x91a   :  { %v781_v60 = vadd.f32 %v780_v61, %v730_v59 }
 0x91b   :  { %v1967_v63 = vpop.f32.mrf.mxu0 }
 0x91c   :  { %v789_v1 = vmul.f32 0.70710677, %v781_v60 }
 0x91d   :  { %v783_v21 = vpop.f32.mrf.mxu0 }
 0x91e   :  { %v791_v40 = vsub.f32 0.0, %v789_v1  ;;  %v784_v2 = vadd.f32 %v783_v21, %v730_v59  ;;  %vm833_vm4 = vcmp.ge.f32.partialorder %v789_v1, 0.0 }
 0x91f   :  { %v1968_v4 = vpop.f32.mrf.mxu0 }
 0x920   :  { %v793_v26 = vmax.f32 %v789_v1, %v791_v40  ;;  %v790_v9 = vmul.f32 0.70710677, %v784_v2 }
 0x922   :  { %v795_v12 = vmul.f32 0.3275911, %v793_v26  ;;  %v792_v16 = vsub.f32 0.0, %v790_v9  ;;  %v821_v24 = vsub.f32 0.0, %v793_v26  ;;  %vm834_vm5 = vcmp.ge.f32.partialorder %v790_v9, 0.0 }
 0x924   :  { %v797_v17 = vadd.f32 1.0, %v795_v12  ;;  %v794_v18 = vmax.f32 %v790_v9, %v792_v16  ;;  %v823_v25 = vmul.f32 %v821_v24, %v793_v26 }
 0x926   :  { %2128 = vrcp.f32 %v797_v17  ;;  %v796_v22 = vmul.f32 0.3275911, %v794_v18  ;;  %v822_v27 = vsub.f32 0.0, %v794_v18  ;;  %v825_v31 = vmul.f32 1.442695, %v823_v25 }
 0x928   :  { %v798_v23 = vadd.f32 1.0, %v796_v22  ;;  %v824_v32 = vmul.f32 %v822_v27, %v794_v18 }
 0x92a   :  { %2130 = vrcp.f32 %v798_v23  ;;  %v827_v42 = vmul.f32 1.442695, %v824_v32  ;;  %v787_v32 = vmul.f32 0.5, %v781_v60 }
 0x92b   :  { %2132 = vpow2.f32 %v825_v31 }
 0x92c   :  { %2134 = vpow2.f32 %v827_v42 }
 0x933   :  { %v2129_v28 = vpop.eup %2128 }
 0x934   :  { %v803_v30 = vmul.f32 1.0614054, %v2129_v28 }
 0x936   :  { %v805_v35 = vadd.f32 -1.4531521, %v803_v30 }
 0x937   :  { %v2131_v36 = vpop.eup %2130 }
 0x938   :  { %v807_v38 = vmul.f32 %v2129_v28, %v805_v35  ;;  %v804_v41 = vmul.f32 1.0614054, %v2131_v36  ;;  %v2133_v4 = vpop.eup %2132  ;;  %v788_v35 = vmul.f32 0.5, %v784_v2 }
 0x939   :  { %v2135_v18 = vpop.eup %2134 }
 0x93a   :  { %v809_v20 = vadd.f32 1.4214138, %v807_v38  ;;  %v806_v43 = vadd.f32 -1.4531521, %v804_v41 }
 0x93c   :  { %v811_v47 = vmul.f32 %v2129_v28, %v809_v20  ;;  %v808_v52 = vmul.f32 %v2131_v36, %v806_v43 }
 0x93e   :  { %v813_v53 = vadd.f32 -0.28449672, %v811_v47  ;;  %v810_v44 = vadd.f32 1.4214138, %v808_v52 }
 0x940   :  { %v815_v57 = vmul.f32 %v2129_v28, %v813_v53  ;;  %v812_v59 = vmul.f32 %v2131_v36, %v810_v44 }
 0x942   :  { %v817_v61 = vadd.f32 0.2548296, %v815_v57  ;;  %v814_v63 = vadd.f32 -0.28449672, %v812_v59 }
 0x944   :  { %v819_v21 = vmul.f32 %v2129_v28, %v817_v61  ;;  %v816_v40 = vmul.f32 %v2131_v36, %v814_v63 }
 0x946   :  { %v829_v26 = vmul.f32 %v2133_v4, %v819_v21  ;;  %v818_v12 = vadd.f32 0.2548296, %v816_v40 }
 0x948   :  { %v831_v16 = vsub.f32 1.0, %v829_v26  ;;  %v820_v17 = vmul.f32 %v2131_v36, %v818_v12  ;;  %v924_v36 = vsub.s32 7, %v2351_v49  ;;  %v2076_v12 = vld [vmem:[%s2802_s6 + $0x18] sm:$0xff]   ;;  %v1688_v49 = vld [vmem:[%s2809_s5 + $0x8] sm:$0xff] }
 0x949   :  { %1982 = vmatpush3.bf16.msra.mxu0 %v2076_v12 }
 0x94a   :  { %v835_v22 = vsub.f32 0.0, %v831_v16  ;;  %v830_v23 = vmul.f32 %v2135_v18, %v820_v17  ;;  %v925_v1 = vrot.slane %v2359_v51, %v924_v36  ;;  %1983 = vmatprep.subr.bf16.mxu0 %v2197_v39 }
 0x94c   :  { %v837_v24 = vsel %vm833_vm4, %v831_v16, %v835_v22  ;;  %v832_v25 = vsub.f32 1.0, %v830_v23  ;;  %v2077_v16 = vld [vmem:[%s2802_s6 + $0x10] sm:$0xff]  }
 0x94d   :  { %v839_v30 = vadd.f32 1.0, %v837_v24  ;;  %1984 = vmatpush3.bf16.msra.mxu0 %v2077_v16 }
 0x94e   :  { %v836_v27 = vsub.f32 0.0, %v832_v25 }
 0x94f   :  { %v841_v28 = vmul.f32 %v839_v30, %v787_v32 }
 0x950   :  { %v838_v31 = vsel %vm834_vm5, %v832_v25, %v836_v27  ;;  %v2609_v27 = vld [vmem:[%s2803_s10 + $0x8] sm:$0xff] }
 0x951   :  { %v840_v38 = vadd.f32 1.0, %v838_v31  ;;  %v959_v32 = vrot.slane %v2609_v27, %v2354_v50 }
 0x953   :  { %v842_v41 = vmul.f32 %v840_v38, %v788_v35 }
 0x955   :  { %v851_v42 = vpack.c.bf16 %v842_v41, %v841_v28  ;;  %v965_v41 = vrot.slane %v2609_v27, %v2364_v55 }
 0x957   :  { %1978 = vmatmul.mubr.msk.bf16.vlgmr.msra.gmra.mxu1 %vm149_vm0, %v851_v42 }
 0xa17   :  { %v913_v20 = vpop.f32.mrf.mxu1 }
 0xa18   :  { %v920_v43 = vadd.f32 %v913_v20, %v2529_v54 }
 0xa19   :  { %v1979_v47 = vpop.f32.mrf.mxu1 }
 0xa1a   :  { %v2586_v9 = vadd.f32 %v925_v1, %v920_v43  ;;  %v977_v47 = vrot.slane %v2609_v27, %v2370_v0 }
 0xa1b   :  { %v916_v60 = vpop.f32.mrf.mxu1 }
 0xa1c   :  { %v921_v2 = vadd.f32 %v916_v60, %v2534_v62  ;;  %v930_v52 = vsel %vm211_vm1, %v2586_v9, 0.0 }
 0xa1d   :  { %931 = vadd.xlane.f32.xlu0 %v930_v52  ;;  %v1980_v53 = vpop.f32.mrf.mxu1 }
 0xa1e   :  { %v2591_v44 = vadd.f32 %v925_v1, %v921_v2 }
 0xa20   :  { %v933_v57 = vsel %vm211_vm1, %v2591_v44, 0.0 }
 0xa21   :  { %934 = vadd.xlane.f32.xlu1 %v933_v57 }
 0xaa6   :  { %v932_v51 = vpop.xlane.xlu0 %931 }
 0xaa7   :  { %v936_v59 = vmul.f32 0.03125, %v932_v51 }
 0xaa9   :  { %v938_v54 = vsub.f32 %v2586_v9, %v936_v59 }
 0xaaa   :  { %v935_v61 = vpop.xlane.xlu1 %934 }
 0xaab   :  { %v937_v63 = vmul.f32 0.03125, %v935_v61  ;;  %v940_v21 = vmul.f32 %v938_v54, %v938_v54 }
 0xaad   :  { %v939_v62 = vsub.f32 %v2591_v44, %v937_v63  ;;  %v942_v40 = vsel %vm211_vm1, %v940_v21, 0.0 }
 0xaae   :  { %943 = vadd.xlane.f32.xlu0 %v942_v40 }
 0xaaf   :  { %v941_v4 = vmul.f32 %v939_v62, %v939_v62 }
 0xab1   :  { %v945_v26 = vsel %vm211_vm1, %v941_v4, 0.0 }
 0xab2   :  { %946 = vadd.xlane.f32.xlu0 %v945_v26 }
 0xb37   :  { %v944_v17 = vpop.xlane.xlu0 %943 }
 0xb38   :  { %v948_v18 = vmul.f32 0.03125, %v944_v17 }
 0xb3a   :  { %v950_v22 = vadd.f32 1e-12, %v948_v18 }
 0xb3b   :  { %v947_v23 = vpop.xlane.xlu0 %946 }
 0xb3c   :  { %2136 = vrsqrt.f32 %v950_v22  ;;  %v949_v24 = vmul.f32 0.03125, %v947_v23 }
 0xb3e   :  { %v951_v25 = vadd.f32 1e-12, %v949_v24 }
 0xb40   :  { %2138 = vrsqrt.f32 %v951_v25 }
 0xb49   :  { %v2137_v30 = vpop.eup %2136 }
 0xb4a   :  { %v954_v31 = vmul.f32 %v2137_v30, %v938_v54 }
 0xb4c   :  { %v960_v28 = vmul.f32 %v959_v32, %v954_v31 }
 0xb4d   :  { %v2139_v35 = vpop.eup %2138 }
 0xb4e   :  { %v955_v38 = vmul.f32 %v2139_v35, %v939_v62  ;;  %v966_v1 = vadd.f32 %v965_v41, %v960_v28 }
 0xb50   :  { %v961_v42 = vmul.f32 %v959_v32, %v955_v38 }
 0xb52   :  { %v967_v20 = vadd.f32 %v965_v41, %v961_v42 }
 0xb54   :  { %v973_v43 = vpack.c.bf16 %v967_v20, %v966_v1 }
 0xb56   :  { %1986 = vmatmul.mubr.msk.bf16.vlgmr.msra.gmra.mxu0 %vm211_vm1, %v973_v43 }
 0xc16   :  { %v1027_v60 = vpop.f32.mrf.mxu0 }
 0xc17   :  { %v1028_v2 = vadd.f32 %v1027_v60, %v977_v47 }
 0xc18   :  { %v1987_v52 = vpop.f32.mrf.mxu0 }
 0xc19   :  { %v1036_v51 = vmul.f32 %v1028_v2, %v2377_v5  ;;  %v1034_v54 = vmul.f32 %v1028_v2, %v2382_v6  ;;  %v1038_v61 = vmul.f32 %v1028_v2, %v2387_v7  ;;  %v1040_v4 = vmul.f32 %v1028_v2, %v2407_v13 }
 0xc1a   :  { %v1030_v53 = vpop.f32.mrf.mxu0 }
 0xc1b   :  { %v1031_v57 = vadd.f32 %v1030_v53, %v977_v47 }
 0xc1c   :  { %v1988_v59 = vpop.f32.mrf.mxu0 }
 0xc1d   :  { %v1037_v63 = vmul.f32 %v1031_v57, %v2392_v8  ;;  %v2622_v21 = vpack.c.bf16 %v1031_v57, %v1028_v2  ;;  %v1035_v62 = vmul.f32 %v1031_v57, %v2397_v10  ;;  %v1039_v40 = vmul.f32 %v1031_v57, %v2402_v11 }
 0xc1e   :  { %v1041_v26 = vmul.f32 %v1031_v57, %v2412_v14 }
 0xc1f   :  { %1048 = vrot.lane.b32.xlu0 %v2622_v21, %s2199_s26  ;;  %v1042_v5 = vpack.c.bf16 %v1035_v62, %v1034_v54  ;;  %v1043_v12 = vpack.c.bf16 %v1037_v63, %v1036_v51  ;;  %v1044_v6 = vpack.c.bf16 %v1039_v40, %v1038_v61 }
 0xc20   :  { %v1045_v16 = vpack.c.bf16 %v1041_v26, %v1040_v4 }
 0xc21   :  { %1991 = vmatprep.mubr.msk.bf16.mxu0 %vm211_vm1, %v1042_v5 }
 0xc91   :  { %v1049_v7 = vpop.permute.xlu0 %1048 }
 0xc92   :  { %v1063_v8 = vsel %vm211_vm1, %v1049_v7, 0  ;;  %2046 = vmatprep.subr.msk.bf16.mxu0 %vm211_vm1, %v1049_v7 }
 0xc93   :  { %1990 = vmatpush3.bf16.xpose.msra.mxu0 %v1063_v8 }
 0xc94   :  { %2009 = vmatprep.subr.bf16.mxu0 %v2197_v39 }
 0xc9a   :  { %1992 = vmatmul.mubr.msk.bf16.vlgmr.msra.gmra.mxu0 %vm211_vm1, %v1043_v12 }
 0xc9b   :  { %1995 = vmatprep.mubr.msk.bf16.mxu0 %vm211_vm1, %v1044_v6 }
 0xca2   :  { %1996 = vmatmul.mubr.msk.bf16.gmra.mxu0 %vm211_vm1, %v1045_v16 }
 0xca3   :  { %2013 = vmatprep.mubr.msk.bf16.mxu0 %vm2198_vm2, %v2197_v39 }
 0xd5a   :  { %v1993_v10 = vpop.f32.mrf.mxu0 }
 0xd5b   :  { %v1132_v11 = vmul.f32 0.35355338, %v1993_v10 }
 0xd5c   :  { %v1099_v13 = vpop.f32.mrf.mxu0 }
 0xd5d   :  { %v1130_v14 = vmul.f32 0.35355338, %v1099_v13  ;;  %v1140_v17 = vadd.f32 %v1132_v11, %v2435_v34 }
 0xd5e   :  { %v1994_v18 = vpop.f32.mrf.mxu0 }
 0xd5f   :  { %v1133_v22 = vmul.f32 0.35355338, %v1994_v18  ;;  %v1152_v23 = vsel %vm428_vm3, %v1140_v17, -inf  ;;  %v1138_v24 = vadd.f32 %v1130_v14, %v2440_v37 }
 0xd60   :  { %1153 = vmax.xlane.f32.xlu1 %v1152_v23  ;;  %v1102_v25 = vpop.f32.mrf.mxu0 }
 0xd61   :  { %v1131_v30 = vmul.f32 0.35355338, %v1102_v25  ;;  %v1146_v31 = vsel %vm428_vm3, %v1138_v24, -inf  ;;  %v1141_v32 = vadd.f32 %v1133_v22, %v2448_v46 }
 0xd62   :  { %1147 = vmax.xlane.f32.xlu0 %v1146_v31  ;;  %v1997_v35 = vpop.f32.mrf.mxu0 }
 0xd63   :  { %v1136_v38 = vmul.f32 0.35355338, %v1997_v35  ;;  %v1155_v28 = vsel %vm428_vm3, %v1141_v32, -inf  ;;  %v1139_v34 = vadd.f32 %v1131_v30, %v2460_v58 }
 0xd64   :  { %1156 = vmax.xlane.f32.xlu1 %v1155_v28  ;;  %v1115_v41 = vpop.f32.mrf.mxu0 }
 0xd65   :  { %v1134_v1 = vmul.f32 0.35355338, %v1115_v41  ;;  %v1149_v37 = vsel %vm428_vm3, %v1139_v34, -inf  ;;  %v1144_v20 = vadd.f32 %v1136_v38, %v2453_v48 }
 0xd66   :  { %v1998_v42 = vpop.f32.mrf.mxu0 }
 0xd67   :  { %v1164_v46 = vsel %vm428_vm3, %v1144_v20, -inf  ;;  %v1142_v60 = vadd.f32 %v1134_v1, %v2469_v3  ;;  %v1137_v2 = vmul.f32 0.35355338, %v1998_v42 }
 0xd68   :  { %1150 = vmax.xlane.f32.xlu1 %v1149_v37  ;;  %v1118_v43 = vpop.f32.mrf.mxu0 }
 0xd69   :  { %v1135_v47 = vmul.f32 0.35355338, %v1118_v43  ;;  %v1158_v52 = vsel %vm428_vm3, %v1142_v60, -inf  ;;  %v1145_v57 = vadd.f32 %v1137_v2, %v2483_v19 }
 0xd6b   :  { %v1143_v58 = vadd.f32 %v1135_v47, %v2476_v15  ;;  %v1167_v48 = vsel %vm428_vm3, %v1145_v57, -inf }
 0xd6c   :  { %1165 = vmax.xlane.f32.xlu1 %v1164_v46 }
 0xd6d   :  { %v1161_v53 = vsel %vm428_vm3, %v1143_v58, -inf }
 0xd70   :  { %1159 = vmax.xlane.f32.xlu1 %v1158_v52 }
 0xd74   :  { %1162 = vmax.xlane.f32.xlu1 %v1161_v53 }
 0xd78   :  { %1168 = vmax.xlane.f32.xlu1 %v1167_v48 }
 0xde9   :  { %v1154_v51 = vpop.xlane.xlu1 %1153 }
 0xdea   :  { %v1172_v59 = vsub.f32 %v1140_v17, %v1154_v51 }
 0xdeb   :  { %v1148_v54 = vpop.xlane.xlu0 %1147 }
 0xdec   :  { %v1182_v61 = vmul.f32 1.442695, %v1172_v59  ;;  %v1170_v3 = vsub.f32 %v1138_v24, %v1148_v54 }
 0xded   :  { %v1157_v63 = vpop.xlane.xlu1 %1156 }
 0xdee   :  { %2140 = vpow2.f32 %v1182_v61  ;;  %v1178_v62 = vmul.f32 1.442695, %v1170_v3  ;;  %v1173_v40 = vsub.f32 %v1141_v32, %v1157_v63 }
 0xdf0   :  { %2142 = vpow2.f32 %v1178_v62  ;;  %v1184_v26 = vmul.f32 1.442695, %v1173_v40 }
 0xdf1   :  { %v1151_v15 = vpop.xlane.xlu1 %1150 }
 0xdf2   :  { %v1171_v4 = vsub.f32 %v1139_v34, %v1151_v15 }
 0xdf4   :  { %v1180_v5 = vmul.f32 1.442695, %v1171_v4 }
 0xdf5   :  { %v1166_v12 = vpop.xlane.xlu1 %1165 }
 0xdf6   :  { %2144 = vpow2.f32 %v1180_v5  ;;  %v1176_v19 = vsub.f32 %v1144_v20, %v1166_v12 }
 0xdf7   :  { %2146 = vpow2.f32 %v1184_v26 }
 0xdf8   :  { %v1190_v6 = vmul.f32 1.442695, %v1176_v19 }
 0xdf9   :  { %v1160_v16 = vpop.xlane.xlu1 %1159 }
 0xdfa   :  { %2148 = vpow2.f32 %v1190_v6  ;;  %v1174_v7 = vsub.f32 %v1142_v60, %v1160_v16 }
 0xdfb   :  { %v2655_v8 = vpop.eup %2140 }
 0xdfc   :  { %v1186_v10 = vmul.f32 1.442695, %v1174_v7  ;;  %v1200_v11 = vsel %vm428_vm3, %v2655_v8, 0.0 }
 0xdfd   :  { %v2143_v13 = vpop.eup %2142  ;;  %1201 = vadd.xlane.f32.xlu1 %v1200_v11  ;;  %v1163_v14 = vpop.xlane.xlu1 %1162  ;;  %v2079_v11 = vld [vmem:[%s2806_s7 + $0x10] sm:$0xff]  }
 0xdfe   :  { %2150 = vpow2.f32 %v1186_v10  ;;  %v1175_v17 = vsub.f32 %v1143_v58, %v1163_v14  ;;  %v1194_v22 = vsel %vm428_vm3, %v2143_v13, 0.0 }
 0xe00   :  { %v1188_v18 = vmul.f32 1.442695, %v1175_v17 }
 0xe01   :  { %1195 = vadd.xlane.f32.xlu1 %v1194_v22  ;;  %v1169_v23 = vpop.xlane.xlu1 %1168 }
 0xe02   :  { %2152 = vpow2.f32 %v1188_v18  ;;  %v1177_v24 = vsub.f32 %v1145_v57, %v1169_v23  ;;  %v2188_v23 = vld [vmem:[%s2804_s3] sm:$0xff] }
 0xe03   :  { %v2145_v25 = vpop.eup %2144 }
 0xe04   :  { %v1192_v30 = vmul.f32 1.442695, %v1177_v24  ;;  %v1197_v31 = vsel %vm428_vm3, %v2145_v25, 0.0  ;;  %v2147_v32 = vpop.eup %2146 }
 0xe05   :  { %1198 = vadd.xlane.f32.xlu0 %v1197_v31  ;;  %v1203_v38 = vsel %vm428_vm3, %v2147_v32, 0.0 }
 0xe06   :  { %2154 = vpow2.f32 %v1192_v30  ;;  %v2189_v30 = vld [vmem:[%s2804_s3 + $0x10] sm:$0xff] }
 0xe07   :  { %v2149_v35 = vpop.eup %2148 }
 0xe08   :  { %v1212_v28 = vsel %vm428_vm3, %v2149_v35, 0.0 }
 0xe09   :  { %1204 = vadd.xlane.f32.xlu0 %v1203_v38  ;;  %1213 = vadd.xlane.f32.xlu1 %v1212_v28  ;;  %v2191_v38 = vld [vmem:[%s2804_s3 + $0x20] sm:$0xff] }
 0xe0b   :  { %v2151_v34 = vpop.eup %2150 }
 0xe0c   :  { %v1206_v41 = vsel %vm428_vm3, %v2151_v34, 0.0 }
 0xe0d   :  { %1207 = vadd.xlane.f32.xlu1 %v1206_v41 }
 0xe0f   :  { %v2153_v42 = vpop.eup %2152 }
 0xe10   :  { %v1209_v1 = vsel %vm428_vm3, %v2153_v42, 0.0 }
 0xe11   :  { %1210 = vadd.xlane.f32.xlu0 %v1209_v1 }
 0xe13   :  { %v2155_v37 = vpop.eup %2154 }
 0xe14   :  { %v1215_v20 = vsel %vm428_vm3, %v2155_v37, 0.0 }
 0xe15   :  { %1216 = vadd.xlane.f32.xlu0 %v1215_v20 }
 0xe1e   :  { %1238 = vrot.lane.b32.xlu1 %v2622_v21, %s2200_s4 }
 0xe86   :  { %v1202_v43 = vpop.xlane.xlu1 %1201 }
 0xe8a   :  { %v1196_v47 = vpop.xlane.xlu1 %1195 }
 0xe8b   :  { %2156 = vrcp.f32 %v1196_v47  ;;  %v2193_v47 = vld [vmem:[%s2804_s3 + $0x28] sm:$0xff] }
 0xe8e   :  { %v1199_v46 = vpop.xlane.xlu0 %1198 }
 0xe8f   :  { %2158 = vrcp.f32 %v1199_v46 }
 0xe90   :  { %2160 = vrcp.f32 %v1202_v43 }
 0xe92   :  { %v1205_v60 = vpop.xlane.xlu0 %1204  ;;  %v1214_v2 = vpop.xlane.xlu1 %1213 }
 0xe93   :  { %2162 = vrcp.f32 %v1205_v60  ;;  %v2194_v60 = vld [vmem:[%s2804_s3 + $0x30] sm:$0xff] }
 0xe96   :  { %v1208_v52 = vpop.xlane.xlu1 %1207 }
 0xe97   :  { %2164 = vrcp.f32 %v1208_v52  ;;  %v2195_v52 = vld [vmem:[%s2804_s3 + $0x38] sm:$0xff] }
 0xe98   :  { %v2157_v58 = vpop.eup %2156 }
 0xe99   :  { %v1226_v21 = vmul.f32 %v2157_v58, %v2143_v13 }
 0xe9a   :  { %v1211_v53 = vpop.xlane.xlu0 %1210  ;;  %v1239_v57 = vpop.permute.xlu1 %1238 }
 0xe9b   :  { %2166 = vrcp.f32 %v1211_v53  ;;  %1999 = vmatprep.subr.bf16.mxu1 %v1239_v57 }
 0xe9c   :  { %v2159_v48 = vpop.eup %2158  ;;  %2000 = vmatpush3.bf16.msra.mxu1 %v1239_v57  ;;  %2168 = vrcp.f32 %v1214_v2 }
 0xe9d   :  { %v1227_v51 = vmul.f32 %v2159_v48, %v2145_v25  ;;  %2017 = vmatprep.subr.bf16.mxu1 %v2197_v39  ;;  %v2161_v59 = vpop.eup %2160 }
 0xe9e   :  { %v1217_v54 = vpop.xlane.xlu0 %1216  ;;  %v1228_v63 = vmul.f32 %v2161_v59, %v2655_v8  ;;  %v2078_v8 = vld [vmem:[%s2806_s7 + $0x18] sm:$0xff]  }
 0xe9f   :  { %2170 = vrcp.f32 %v1217_v54  ;;  %v1234_v61 = vpack.c.bf16 %v1227_v51, %v1226_v21  ;;  %2010 = vmatpush3.bf16.msra.mxu0 %v2078_v8  ;;  %v1399_v51 = vrot.slane %v2609_v27, %v680_v45  ;;  %v2080_v8 = vld [vmem:[%s2807_s8 + $0x18] sm:$0xff]  }
 0xea0   :  { %v2163_v3 = vpop.eup %2162  ;;  %2011 = vmatprep.subr.bf16.mxu0 %v2197_v39 }
 0xea1   :  { %2001 = vmatprep.mubr.msk.bf16.mxu1 %vm428_vm3, %v1234_v61  ;;  %v1229_v62 = vmul.f32 %v2163_v3, %v2147_v32  ;;  %v2190_v32 = vld [vmem:[%s2804_s3 + $0x8] sm:$0xff] }
 0xea3   :  { %v1235_v40 = vpack.c.bf16 %v1229_v62, %v1228_v63  ;;  %2012 = vmatpush3.bf16.msra.mxu0 %v2079_v11  ;;  %v2081_v11 = vld [vmem:[%s2807_s8 + $0x10] sm:$0xff]  }
 0xea4   :  { %v2165_v15 = vpop.eup %2164  ;;  %2025 = vmatprep.subr.bf16.mxu0 %v2197_v39 }
 0xea5   :  { %2002 = vmatmul.mubr.msk.bf16.vlgmr.msra.gmra.mxu1 %vm428_vm3, %v1235_v40  ;;  %v1230_v26 = vmul.f32 %v2165_v15, %v2151_v34 }
 0xea6   :  { %2018 = vmatpush3.bf16.msra.mxu1 %v2080_v8 }
 0xea7   :  { %2019 = vmatprep.subr.bf16.mxu1 %v2197_v39 }
 0xea8   :  { %v2167_v4 = vpop.eup %2166 }
 0xea9   :  { %v1231_v5 = vmul.f32 %v2167_v4, %v2153_v42  ;;  %v2169_v12 = vpop.eup %2168  ;;  %v2192_v42 = vld [vmem:[%s2804_s3 + $0x18] sm:$0xff] }
 0xeaa   :  { %v1232_v16 = vmul.f32 %v2169_v12, %v2149_v35  ;;  %2020 = vmatpush3.bf16.msra.mxu1 %v2081_v11 }
 0xeab   :  { %v1236_v19 = vpack.c.bf16 %v1231_v5, %v1230_v26  ;;  %2037 = vmatprep.subr.bf16.mxu1 %v2197_v39 }
 0xeac   :  { %v2171_v6 = vpop.eup %2170 }
 0xead   :  { %2005 = vmatprep.mubr.msk.bf16.mxu1 %vm428_vm3, %v1236_v19  ;;  %v1233_v7 = vmul.f32 %v2171_v6, %v2155_v37 }
 0xeaf   :  { %v1237_v10 = vpack.c.bf16 %v1233_v7, %v1232_v16 }
 0xeb1   :  { %2006 = vmatmul.mubr.msk.bf16.gmra.mxu1 %vm428_vm3, %v1237_v10 }
 0xeb2   :  { %2021 = vmatprep.mubr.msk.bf16.mxu1 %vm2198_vm2, %v2197_v39 }
 0xf65   :  { %v2003_v13 = vpop.f32.mrf.mxu1 }
 0xf66   :  { %v1320_v31 = vmul.f32 %v2189_v30, %v2003_v13 }
 0xf67   :  { %v1287_v14 = vpop.f32.mrf.mxu1 }
 0xf68   :  { %v1318_v24 = vmul.f32 %v2188_v23, %v1287_v14 }
 0xf69   :  { %v2004_v17 = vpop.f32.mrf.mxu1 }
 0xf6a   :  { %v1326_v41 = vadd.f32 %v1320_v31, %v1318_v24  ;;  %v1321_v1 = vmul.f32 %v2192_v42, %v2004_v17 }
 0xf6b   :  { %v1290_v18 = vpop.f32.mrf.mxu1 }
 0xf6c   :  { %v1319_v35 = vmul.f32 %v2190_v32, %v1290_v18  ;;  %v1437_v32 = vrot.slane %v2609_v27, %v718_v33  ;;  %v2083_v33 = vld [vmem:[%s2808_s9 + $0x30] sm:$0xff]  }
 0xf6e   :  { %v1327_v20 = vadd.f32 %v1321_v1, %v1319_v35  ;;  %v2084_v1 = vld [vmem:[%s2808_s9 + $0x28] sm:$0xff]  }
 0xf71   :  { %v2007_v22 = vpop.f32.mrf.mxu1 }
 0xf72   :  { %v1324_v2 = vmul.f32 %v2194_v60, %v2007_v22 }
 0xf73   :  { %v1303_v25 = vpop.f32.mrf.mxu1 }
 0xf74   :  { %v1322_v28 = vmul.f32 %v2191_v38, %v1303_v25  ;;  %v1431_v25 = vrot.slane %v2609_v27, %v712_v29  ;;  %v2082_v29 = vld [vmem:[%s2808_s9 + $0x38] sm:$0xff]  }
 0xf75   :  { %v2008_v34 = vpop.f32.mrf.mxu1 }
 0xf76   :  { %v1328_v43 = vadd.f32 %v1326_v41, %v1322_v28  ;;  %v1325_v58 = vmul.f32 %v2195_v52, %v2008_v34 }
 0xf77   :  { %v1306_v37 = vpop.f32.mrf.mxu1 }
 0xf78   :  { %v1323_v46 = vmul.f32 %v2193_v47, %v1306_v37  ;;  %v1330_v57 = vadd.f32 %v1328_v43, %v1324_v2  ;;  %v2085_v37 = vld [vmem:[%s2808_s9 + $0x20] sm:$0xff]  }
 0xf7a   :  { %v1329_v53 = vadd.f32 %v1327_v20, %v1323_v46  ;;  %v1449_v20 = vrot.slane %v2609_v27, %v729_v56 }
 0xf7c   :  { %v1331_v48 = vadd.f32 %v1329_v53, %v1325_v58 }
 0xf7e   :  { %v1337_v21 = vpack.c.bf16 %v1331_v48, %v1330_v57 }
 0xf80   :  { %2014 = vmatmul.mubr.msk.bf16.vlgmr.msra.gmra.mxu0 %vm211_vm1, %v1337_v21 }
 0xf81   :  { %2033 = vmatprep.mubr.msk.bf16.mxu0 %vm2198_vm2, %v2197_v39  ;;  %2026 = vmatpush3.bf16.msra.mxu0 %v2082_v29 }
 0xf82   :  { %2027 = vmatprep.subr.bf16.mxu0 %v2197_v39 }
 0xf85   :  { %2028 = vmatpush3.bf16.msra.mxu0 %v2083_v33 }
 0xf86   :  { %2029 = vmatprep.subr.bf16.mxu0 %v2197_v39 }
 0xf89   :  { %2030 = vmatpush3.bf16.msra.mxu0 %v2084_v1 }
 0xf8a   :  { %2031 = vmatprep.subr.bf16.mxu0 %v2197_v39 }
 0xf8d   :  { %2032 = vmatpush3.bf16.msra.mxu0 %v2085_v37 }
0x1040   :  { %v1387_v59 = vpop.f32.mrf.mxu0 }
0x1041   :  { %v1394_v54 = vadd.f32 %v1387_v59, %v2586_v9 }
0x1042   :  { %v2015_v61 = vpop.f32.mrf.mxu0 }
0x1043   :  { %v2715_v3 = vadd.f32 %v1399_v51, %v1394_v54 }
0x1044   :  { %v1390_v63 = vpop.f32.mrf.mxu0 }
0x1045   :  { %v1395_v62 = vadd.f32 %v1390_v63, %v2591_v44  ;;  %v1402_v40 = vsel %vm211_vm1, %v2715_v3, 0.0 }
0x1046   :  { %1403 = vadd.xlane.f32.xlu0 %v1402_v40  ;;  %v2016_v15 = vpop.f32.mrf.mxu0 }
0x1047   :  { %v2720_v4 = vadd.f32 %v1399_v51, %v1395_v62 }
0x1049   :  { %v1405_v26 = vsel %vm211_vm1, %v2720_v4, 0.0 }
0x104a   :  { %1406 = vadd.xlane.f32.xlu0 %v1405_v26 }
0x10cf   :  { %v1404_v45 = vpop.xlane.xlu0 %1403 }
0x10d0   :  { %v1408_v5 = vmul.f32 0.03125, %v1404_v45 }
0x10d2   :  { %v1410_v9 = vsub.f32 %v2715_v3, %v1408_v5 }
0x10d3   :  { %v1407_v12 = vpop.xlane.xlu0 %1406 }
0x10d4   :  { %v1409_v19 = vmul.f32 0.03125, %v1407_v12  ;;  %v1412_v6 = vmul.f32 %v1410_v9, %v1410_v9 }
0x10d6   :  { %v1411_v44 = vsub.f32 %v2720_v4, %v1409_v19  ;;  %v1414_v16 = vsel %vm211_vm1, %v1412_v6, 0.0 }
0x10d7   :  { %1415 = vadd.xlane.f32.xlu0 %v1414_v16 }
0x10d8   :  { %v1413_v7 = vmul.f32 %v1411_v44, %v1411_v44 }
0x10da   :  { %v1417_v10 = vsel %vm211_vm1, %v1413_v7, 0.0 }
0x10db   :  { %1418 = vadd.xlane.f32.xlu0 %v1417_v10 }
0x1160   :  { %v1416_v13 = vpop.xlane.xlu0 %1415 }
0x1161   :  { %v1420_v14 = vmul.f32 0.03125, %v1416_v13 }
0x1163   :  { %v1422_v17 = vadd.f32 1e-12, %v1420_v14 }
0x1164   :  { %v1419_v18 = vpop.xlane.xlu0 %1418 }
0x1165   :  { %2172 = vrsqrt.f32 %v1422_v17  ;;  %v1421_v22 = vmul.f32 0.03125, %v1419_v18 }
0x1167   :  { %v1423_v23 = vadd.f32 1e-12, %v1421_v22 }
0x1169   :  { %2174 = vrsqrt.f32 %v1423_v23 }
0x1172   :  { %v2173_v24 = vpop.eup %2172 }
0x1173   :  { %v1426_v30 = vmul.f32 %v2173_v24, %v1410_v9 }
0x1175   :  { %v1432_v35 = vmul.f32 %v1431_v25, %v1426_v30 }
0x1176   :  { %v2175_v31 = vpop.eup %2174 }
0x1177   :  { %v1427_v38 = vmul.f32 %v2175_v31, %v1411_v44  ;;  %v1438_v34 = vadd.f32 %v1437_v32, %v1432_v35 }
0x1179   :  { %v1433_v28 = vmul.f32 %v1431_v25, %v1427_v38 }
0x117b   :  { %v1439_v41 = vadd.f32 %v1437_v32, %v1433_v28 }
0x117d   :  { %v1445_v42 = vpack.c.bf16 %v1439_v41, %v1438_v34 }
0x117f   :  { %2022 = vmatmul.mubr.msk.bf16.vlgmr.msra.gmra.mxu1 %vm211_vm1, %v1445_v42 }
0x1180   :  { %2041 = vmatprep.mubr.msk.bf16.mxu1 %vm2198_vm2, %v2197_v39 }
0x123f   :  { %v1499_v43 = vpop.f32.mrf.mxu1 }
0x1240   :  { %v1500_v47 = vadd.f32 %v1499_v43, %v1449_v20 }
0x1241   :  { %v2023_v46 = vpop.f32.mrf.mxu1 }
0x1242   :  { %v1508_v60 = vmul.f32 0.70710677, %v1500_v47  ;;  %v1506_v37 = vmul.f32 0.5, %v1500_v47 }
0x1243   :  { %v1502_v2 = vpop.f32.mrf.mxu1 }
0x1244   :  { %v1510_v52 = vsub.f32 0.0, %v1508_v60  ;;  %v1503_v58 = vadd.f32 %v1502_v2, %v1449_v20  ;;  %vm1552_vm6 = vcmp.ge.f32.partialorder %v1508_v60, 0.0 }
0x1245   :  { %v2024_v53 = vpop.f32.mrf.mxu1 }
0x1246   :  { %v1512_v57 = vmax.f32 %v1508_v60, %v1510_v52  ;;  %v1509_v48 = vmul.f32 0.70710677, %v1503_v58  ;;  %v1507_v20 = vmul.f32 0.5, %v1503_v58  ;;  %v1645_v53 = vrot.slane %v2609_v27, %v924_v36 }
0x1248   :  { %v1514_v21 = vmul.f32 0.3275911, %v1512_v57  ;;  %v1511_v51 = vsub.f32 0.0, %v1509_v48  ;;  %v1540_v62 = vsub.f32 0.0, %v1512_v57  ;;  %vm1553_vm7 = vcmp.ge.f32.partialorder %v1509_v48, 0.0 }
0x124a   :  { %v1516_v59 = vadd.f32 1.0, %v1514_v21  ;;  %v1513_v54 = vmax.f32 %v1509_v48, %v1511_v51  ;;  %v1542_v56 = vmul.f32 %v1540_v62, %v1512_v57 }
0x124c   :  { %2176 = vrcp.f32 %v1516_v59  ;;  %v1515_v61 = vmul.f32 0.3275911, %v1513_v54  ;;  %v1541_v40 = vsub.f32 0.0, %v1513_v54  ;;  %v1544_v45 = vmul.f32 1.442695, %v1542_v56 }
0x124e   :  { %v1517_v63 = vadd.f32 1.0, %v1515_v61  ;;  %v1543_v5 = vmul.f32 %v1541_v40, %v1513_v54 }
0x1250   :  { %2178 = vrcp.f32 %v1517_v63  ;;  %v1546_v44 = vmul.f32 1.442695, %v1543_v5  ;;  %v2086_v5 = vld [vmem:[%s2810_s12 + $0x8] sm:$0xff]  }
0x1251   :  { %2180 = vpow2.f32 %v1544_v45  ;;  %v1687_v45 = vld [vmem:[%s2809_s5] sm:$0xff]  ;;  %2038 = vmatpush3.bf16.msra.mxu1 %v2086_v5 }
0x1252   :  { %2182 = vpow2.f32 %v1546_v44  ;;  %2039 = vmatprep.subr.bf16.mxu1 %v2197_v39 }
0x1259   :  { %v2177_v15 = vpop.eup %2176 }
0x125a   :  { %v1522_v26 = vmul.f32 1.0614054, %v2177_v15 }
0x125c   :  { %v1524_v9 = vadd.f32 -1.4531521, %v1522_v26 }
0x125d   :  { %v2179_v12 = vpop.eup %2178 }
0x125e   :  { %v1526_v19 = vmul.f32 %v2177_v15, %v1524_v9  ;;  %v1523_v6 = vmul.f32 1.0614054, %v2179_v12  ;;  %v2181_v25 = vpop.eup %2180  ;;  %v2087_v9 = vld [vmem:[%s2810_s12] sm:$0xff]  }
0x125f   :  { %v2183_v38 = vpop.eup %2182  ;;  %2040 = vmatpush3.bf16.msra.mxu1 %v2087_v9 }
0x1260   :  { %v1528_v16 = vadd.f32 1.4214138, %v1526_v19  ;;  %v1525_v7 = vadd.f32 -1.4531521, %v1523_v6 }
0x1262   :  { %v1530_v10 = vmul.f32 %v2177_v15, %v1528_v16  ;;  %v1527_v8 = vmul.f32 %v2179_v12, %v1525_v7 }
0x1264   :  { %v1532_v11 = vadd.f32 -0.28449672, %v1530_v10  ;;  %v1529_v13 = vadd.f32 1.4214138, %v1527_v8  ;;  %v1648_v10 = vld [vmem:[%s2811_s11] sm:$0xff] }
0x1265   :  { %v1678_v8 = vrot.slane %v1648_v10, %v2354_v50 }
0x1266   :  { %v1534_v14 = vmul.f32 %v2177_v15, %v1532_v11  ;;  %v1531_v17 = vmul.f32 %v2179_v12, %v1529_v13  ;;  %v1684_v13 = vrot.slane %v1648_v10, %v2364_v55 }
0x1268   :  { %v1536_v18 = vadd.f32 0.2548296, %v1534_v14  ;;  %v1533_v22 = vadd.f32 -0.28449672, %v1531_v17 }
0x126a   :  { %v1538_v23 = vmul.f32 %v2177_v15, %v1536_v18  ;;  %v1535_v24 = vmul.f32 %v2179_v12, %v1533_v22 }
0x126c   :  { %v1548_v30 = vmul.f32 %v2181_v25, %v1538_v23  ;;  %v1537_v31 = vadd.f32 0.2548296, %v1535_v24 }
0x126e   :  { %v1550_v32 = vsub.f32 1.0, %v1548_v30  ;;  %v1539_v35 = vmul.f32 %v2179_v12, %v1537_v31 }
0x1270   :  { %v1554_v28 = vsub.f32 0.0, %v1550_v32  ;;  %v1549_v34 = vmul.f32 %v2183_v38, %v1539_v35 }
0x1272   :  { %v1556_v41 = vsel %vm1552_vm6, %v1550_v32, %v1554_v28  ;;  %v1551_v42 = vsub.f32 1.0, %v1549_v34 }
0x1273   :  { %v1558_v33 = vadd.f32 1.0, %v1556_v41 }
0x1274   :  { %v1555_v29 = vsub.f32 0.0, %v1551_v42 }
0x1275   :  { %v1560_v46 = vmul.f32 %v1558_v33, %v1506_v37 }
0x1276   :  { %v1557_v1 = vsel %vm1553_vm7, %v1551_v42, %v1555_v29 }
0x1277   :  { %v1559_v43 = vadd.f32 1.0, %v1557_v1 }
0x1279   :  { %v1561_v2 = vmul.f32 %v1559_v43, %v1507_v20 }
0x127b   :  { %v1571_v52 = vpack.c.bf16 %v1561_v2, %v1560_v46 }
0x127d   :  { %2034 = vmatmul.mubr.msk.bf16.vlgmr.msra.gmra.mxu0 %vm149_vm0, %v1571_v52  ;;  %v1725_v52 = vrot.slane %v1648_v10, %v2370_v0 }
0x133d   :  { %v1633_v57 = vpop.f32.mrf.mxu0 }
0x133e   :  { %v1640_v60 = vadd.f32 %v1633_v57, %v2715_v3 }
0x133f   :  { %v2035_v21 = vpop.f32.mrf.mxu0 }
0x1340   :  { %v1646_v51 = vadd.f32 %v1645_v53, %v1640_v60 }
0x1341   :  { %v1636_v59 = vpop.f32.mrf.mxu0 }
0x1342   :  { %v1641_v48 = vadd.f32 %v1636_v59, %v2720_v4  ;;  %v1649_v47 = vsel %vm211_vm1, %v1646_v51, 0.0 }
0x1343   :  { %1650 = vadd.xlane.f32.xlu0 %v1649_v47  ;;  %v2036_v58 = vpop.f32.mrf.mxu0 }
0x1344   :  { %v1647_v54 = vadd.f32 %v1645_v53, %v1641_v48 }
0x1346   :  { %v1652_v61 = vsel %vm211_vm1, %v1647_v54, 0.0 }
0x1347   :  { %1653 = vadd.xlane.f32.xlu1 %v1652_v61 }
0x1358   :  { %1696 = vperm.xlu1 %2053, %v1688_v49  }
0x13cc   :  { %v1651_v36 = vpop.xlane.xlu0 %1650 }
0x13cd   :  { %v1655_v27 = vmul.f32 0.03125, %v1651_v36 }
0x13cf   :  { %v1657_v3 = vsub.f32 %v1646_v51, %v1655_v27 }
0x13d0   :  { %v1654_v63 = vpop.xlane.xlu1 %1653 }
0x13d1   :  { %v1656_v62 = vmul.f32 0.03125, %v1654_v63  ;;  %v1659_v56 = vmul.f32 %v1657_v3, %v1657_v3 }
0x13d3   :  { %v1658_v4 = vsub.f32 %v1647_v54, %v1656_v62  ;;  %v1661_v40 = vsel %vm211_vm1, %v1659_v56, 0.0 }
0x13d4   :  { %1662 = vadd.xlane.f32.xlu0 %v1661_v40  ;;  %v1697_v30 = vpop.permute.xlu1 %1696 }
0x13d5   :  { %v1660_v15 = vmul.f32 %v1658_v4, %v1658_v4 }
0x13d7   :  { %v1664_v26 = vsel %vm211_vm1, %v1660_v15, 0.0 }
0x13d8   :  { %1665 = vadd.xlane.f32.xlu0 %v1664_v26 }
0x13ee   :  { %1691 = vperm.xlu0 %2052, %v1687_v45  }
0x145d   :  { %v1663_v12 = vpop.xlane.xlu0 %1662 }
0x145e   :  { %v1667_v19 = vmul.f32 0.03125, %v1663_v12 }
0x1460   :  { %v1669_v6 = vadd.f32 1e-12, %v1667_v19 }
0x1461   :  { %v1666_v44 = vpop.xlane.xlu0 %1665 }
0x1462   :  { %2184 = vrsqrt.f32 %v1669_v6  ;;  %v1668_v16 = vmul.f32 0.03125, %v1666_v44 }
0x1464   :  { %v1670_v7 = vadd.f32 1e-12, %v1668_v16 }
0x1466   :  { %2186 = vrsqrt.f32 %v1670_v7 }
0x1469   :  { %v1692_v18 = vpop.permute.xlu0 %1691 }
0x146f   :  { %v2185_v39 = vpop.eup %2184 }
0x1470   :  { %v1673_v11 = vmul.f32 %v2185_v39, %v1657_v3 }
0x1472   :  { %v1679_v14 = vmul.f32 %v1678_v8, %v1673_v11 }
0x1473   :  { %v2187_v17 = vpop.eup %2186 }
0x1474   :  { %v1685_v22 = vadd.f32 %v1684_v13, %v1679_v14  ;;  %v1674_v23 = vmul.f32 %v2187_v17, %v1658_v4 }
0x1476   :  { %v1699_v24 = vmul.f32 %v1692_v18, %v1685_v22  ;;  %v1680_v25 = vmul.f32 %v1678_v8, %v1674_v23 }
0x1478   :  { %v1701_v31 = vsel %vm211_vm1, %v1699_v24, 0.0  ;;  %v1686_v32 = vadd.f32 %v1684_v13, %v1680_v25 }
0x1479   :  { %v1702_v35 = vrot.slane %v1701_v31, 4 }
0x147a   :  { %v1700_v38 = vmul.f32 %v1697_v30, %v1686_v32 }
0x147b   :  { %v1703_v28 = vadd.f32 %v1702_v35, %v1701_v31 }
0x147c   :  { %v1708_v50 = vsel %vm211_vm1, %v1700_v38, 0.0 }
0x147d   :  { %v1704_v34 = vrot.slane %v1703_v28, 2  ;;  %v1709_v41 = vrot.slane %v1708_v50, 4 }
0x147f   :  { %v1705_v42 = vadd.f32 %v1704_v34, %v1703_v28  ;;  %v1710_v55 = vadd.f32 %v1709_v41, %v1708_v50 }
0x1481   :  { %v1711_v29 = vrot.slane %v1710_v55, 2  ;;  %v1706_v33 = vrot.slane %v1705_v42, 1 }
0x1483   :  { %v1712_v1 = vadd.f32 %v1711_v29, %v1710_v55  ;;  %v1707_v20 = vadd.f32 %v1706_v33, %v1705_v42 }
0x1485   :  { %v1713_v37 = vrot.slane %v1712_v1, 1 }
0x1487   :  { %v1714_v43 = vadd.f32 %v1713_v37, %v1712_v1 }
0x1489   :  { %v1716_v46 = vsel %vm1715_vm8, %v1707_v20, %v1714_v43 }
0x148a   :  { %v1721_v2 = vpack.c.bf16 %v1716_v46, %v1716_v46  ;;  %v1782_v57 = vsel %vm211_vm1, %v1716_v46, 0.0 }
0x148b   :  { %v1784_v59 = vrot.slane %v1782_v57, 6 }
0x148c   :  { %2042 = vmatmul.mubr.msk.bf16.vlgmr.msra.gmra.mxu1 %vm211_vm1, %v1721_v2 }
0x154c   :  { %v1775_v53 = vpop.f32.mrf.mxu1 }
0x154d   :  { %v1776_v60 = vadd.f32 %v1775_v53, %v1725_v52 }
0x154e   :  { %v2043_v21 = vpop.f32.mrf.mxu1 }
0x154f   :  { %v1781_v51 = vmax.f32 %v1776_v60, 0.0 }
0x1550   :  { %v1778_v48 = vpop.f32.mrf.mxu1 }
0x1551   :  { %v1787_v47 = vsel %vm1786_vm9, %v1781_v51, %v1784_v59 }
0x1552   :  { %1788 = vst [vmem:[%s2812_s13] sm:$0xf] %v1787_v47  ;;  %v2044_v58 = vpop.f32.mrf.mxu1 }

</bundles_post_ra>
